<compile_context>
chip_gen: v5e
topology: v5e:2x2
jax: 0.10.0
libtpu: 0.0.40
codegen_flags: <defaults>
</compile_context>

<pallas_src>
import functools

import jax
import jax.numpy as jnp
from jax.experimental import pallas as pl
from jax.experimental.pallas import tpu as pltpu

_GN_EPS = 1e-10           # GroupBatchnorm2d default eps
_MAX_BLOCK_LANES = 2048   # pack images per grid step while NB*HW <= this


# ---------------------------------------------------------------------------
# Small in-kernel helpers for per-image (lane-segment) reductions/broadcasts
# ---------------------------------------------------------------------------
def _seg_sum(a, nb, hw):
    """Per-image lane-segment sum: (R, nb*hw) -> (R, nb).  Static 128-aligned slices."""
    cols = [jnp.sum(a[:, b * hw:(b + 1) * hw], axis=1, keepdims=True)
            for b in range(nb)]
    return cols[0] if nb == 1 else jnp.concatenate(cols, axis=1)


def _seg_bcast(v, nb, hw):
    """Broadcast per-image scalars back over lanes: (R, nb) -> (R, nb*hw)."""
    outs = [jnp.broadcast_to(v[:, b:b + 1], (v.shape[0], hw)) for b in range(nb)]
    return outs[0] if nb == 1 else jnp.concatenate(outs, axis=1)


# ---------------------------------------------------------------------------
# Fused ScConv kernel: one grid step processes NB images laid out on lanes
# ---------------------------------------------------------------------------
def _scconv_kernel(x_ref, pp_ref, grp_ref, tmask_ref, wsq_ref, wgwc_ref,
                   wpwc2_ref, o_ref, *, W, hw, nb, cpg, ups):
    C = x_ref.shape[0]
    N = x_ref.shape[1]                 # NB * HW
    n = cpg * hw                       # elements per (GN group, image)
    f32 = jnp.float32

    x = x_ref[...]                     # (C, N)

    # Merged per-channel params: [gamma*softmax(gamma), beta*softmax(gamma),
    #                             info_mask, GWC bias]  -> single DMA.
    pp = pp_ref[...]
    gw, bw = pp[:, 0:1], pp[:, 1:2]
    imask, bgwc = pp[:, 2:3], pp[:, 3:4]

    # ---------------- SRU : GroupBatchnorm2d statistics ----------------
    # Exact per-channel lane sums per image, then a tiny (C,C)@(C,nb) matmul
    # with the precomputed 0/1 group-membership matrix to aggregate/broadcast
    # over each group's channels (keeps the bulk reduction off the MXU).
    grp = grp_ref[...]                                            # (C, C)
    ch_sum = _seg_sum(x, nb, hw)                                  # (C, nb)
    mean = jnp.dot(grp, ch_sum, preferred_element_type=f32) * (1.0 / n)
    cen = x - _seg_bcast(mean, nb, hw)
    ch_sq = _seg_sum(cen * cen, nb, hw)                           # (C, nb)
    var = jnp.dot(grp, ch_sq, preferred_element_type=f32) * (1.0 / (n - 1))
    inv_std = 1.0 / (jnp.sqrt(var) + _GN_EPS)                     # torch: /(std+eps)

    # ---------------- SRU : gating + reconstruct (fused with CRU split) -----
    # z = gn_x * softmax(gamma), with gamma/beta folded:  z = cen*inv*gw + bw
    z = cen * _seg_bcast(inv_std * gw, nb, hw) + bw
    rew = pl.reciprocal(1.0 + jnp.exp(-z), approx=True)           # sigmoid (EUP)
    rw_x = rew * x
    x1 = imask * rw_x
    x2 = rw_x - x1
    h = C // 2
    up = x1[:h] + x2[h:]               # reconstruct + split: no concat needed
    low = x1[h:] + x2[:h]

    # ---------------- CRU ----------------
    md = wsq_ref.dtype                 # matmul operand dtype (f32 or bf16)
    wsq = wsq_ref[...]
    up_s = jnp.dot(wsq[:ups], up.astype(md), preferred_element_type=f32)
    low_s = jnp.dot(wsq[ups:], low.astype(md), preferred_element_type=f32)

    # GWC (grouped 3x3 densified block-diagonal, PWC1 folded into the centre
    # tap) as ONE im2col matmul.  Taps are XLU lane rotations + precomputed
    # boundary masks; valid positions never wrap across image boundaries.
    tmask = tmask_ref[...]                                        # (9, N)
    taps = []
    for ky in range(3):
        for kx in range(3):
            s = (ky - 1) * W + (kx - 1)        # flattened source offset
            if s == 0:
                taps.append(up_s)              # centre tap: always valid
            else:
                shifted = pltpu.roll(up_s, shift=(-s) % N, axis=1)
                t = ky * 3 + kx
                taps.append(shifted * tmask[t:t + 1, :])
    patches = jnp.concatenate(taps, axis=0)                       # (9*ups, N)

    y1 = jnp.dot(wgwc_ref[...], patches.astype(md),
                 preferred_element_type=f32) + bgwc               # (C, N)
    y2a = jnp.dot(wpwc2_ref[...], low_s.astype(md),
                  preferred_element_type=f32)                     # (C-lows, N)
    out_cat = jnp.concatenate([y1, y2a, low_s], axis=0)           # (2C, N)

    # softmax(AdaptiveAvgPool2d(1)(out), dim=channel) * out  (per image)
    ch_mean = _seg_sum(out_cat, nb, hw) * (1.0 / hw)              # (2C, nb)
    ch_max = jnp.max(ch_mean, axis=0, keepdims=True)
    e = jnp.exp(ch_mean - ch_max)
    sm = e * pl.reciprocal(jnp.sum(e, axis=0, keepdims=True), approx=True)
    out_w = _seg_bcast(sm, nb, hw) * out_cat
    o_ref[...] = out_w[:C] + out_w[C:]                            # out1 + out2


# ---------------------------------------------------------------------------
# Wrapper: parameter-only prep + single pallas_call over lane-batched images
# ---------------------------------------------------------------------------
def scconv_forward(params, x, *, group_num=16, gate_treshold=0.5,
                   squeeze_radio=2, group_size=2, batch_block=None,
                   matmul_dtype=jnp.float32):
    """ScConv forward (SRU -> CRU).  x is NCHW; returns NCHW."""
    B, C, H, W = x.shape
    HW = H * W
    assert C % group_num == 0, "C must be divisible by group_num"
    up_c = C // 2                               # alpha = 1/2
    low_c = C - up_c
    assert up_c == low_c and up_c % squeeze_radio == 0
    ups = up_c // squeeze_radio
    lows = low_c // squeeze_radio
    cpg = C // group_num
    f32 = jnp.float32

    # Images per grid step (lane batching).  NB must divide B.  Note: on v7x
    # (2 TensorCores) prefer a batch_block that keeps grid length B//NB a
    # multiple of 2 so both cores stay busy.
    if batch_block is None:
        nb_cap = max(1, _MAX_BLOCK_LANES // HW)
        batch_block = 1
        for cand in range(min(B, nb_cap), 0, -1):
            if B % cand == 0:
                batch_block = cand
                break
    NB = batch_block
    assert B % NB == 0
    N = NB * HW
    assert C % 8 == 0 and N % 128 == 0, "tile must satisfy the (8,128) rule"

    # ---- parameter-only preprocessing (tiny; constant-folded under jit) ----
    gamma = params["gn_gamma"].astype(f32).reshape(C)
    beta = params["gn_beta"].astype(f32).reshape(C)
    w_gamma = jax.nn.softmax(gamma)
    pp = jnp.stack([gamma * w_gamma,                          # fold gamma*softmax
                    beta * w_gamma,                           # fold beta*softmax
                    (w_gamma > gate_treshold).astype(f32),    # info mask
                    params["b_gwc"].astype(f32).reshape(C)],  # GWC bias
                   axis=1)                                    # (C, 4): one DMA

    # 0/1 GN group-membership matrix (hoisted out of the kernel).
    ch = jnp.arange(C) // cpg
    grp = (ch[:, None] == ch[None, :]).astype(f32)            # (C, C)

    # squeeze1 / squeeze2 stacked into one block (one DMA).
    w_sq = jnp.concatenate(
        [params["w_sq1"].astype(f32).reshape(ups, up_c),
         params["w_sq2"].astype(f32).reshape(lows, low_c)],
        axis=0).astype(matmul_dtype)                          # (2*ups, up_c)

    # Densify grouped GWC weight to block-diagonal taps, fold PWC1 (linearity)
    # into the centre tap, flatten to the im2col weight (C, 9*ups).
    cig = ups // group_size
    cog = C // group_size
    w_gwc = params["w_gwc"].astype(f32)                       # (C, cig, 3, 3)
    wg = jnp.zeros((9, C, ups), f32)
    for g in range(group_size):
        blk = jnp.transpose(w_gwc[g * cog:(g + 1) * cog], (2, 3, 0, 1))
        wg = wg.at[:, g * cog:(g + 1) * cog, g * cig:(g + 1) * cig].set(
            blk.reshape(9, cog, cig))
    wg = wg.at[4].add(params["w_pwc1"].astype(f32))           # centre tap (ky=kx=1)
    wg_flat = jnp.transpose(wg, (1, 0, 2)).reshape(C, 9 * ups).astype(matmul_dtype)
    w_pwc2 = (params["w_pwc2"].astype(f32)
              .reshape(C - lows, lows).astype(matmul_dtype))

    # Per-tap boundary masks, batch-invariant, hoisted out of the kernel and
    # tiled per image so they can be applied directly to (ups, NB*HW) taps.
    pos = jnp.arange(HW)
    row, col = pos // W, pos % W
    masks = []
    for ky in range(3):
        for kx in range(3):
            dy, dx = ky - 1, kx - 1
            valid = ((row + dy >= 0) & (row + dy < H) &
                     (col + dx >= 0) & (col + dx < W)).astype(f32)
            masks.append(jnp.tile(valid, NB))
    tap_mask = jnp.stack(masks, axis=0)                       # (9, NB*HW)

    # Channels on sublanes, flattened (batch, spatial) on lanes -> lane-dense
    # loads/stores and matmul N = NB*HW.
    x_cn = x.astype(f32).reshape(B, C, HW).transpose(1, 0, 2).reshape(C, B * HW)

    kernel = functools.partial(_scconv_kernel, W=W, hw=HW, nb=NB, cpg=cpg, ups=ups)
    const = lambda g: (0, 0)
    out = pl.pallas_call(
        kernel,
        out_shape=jax.ShapeDtypeStruct((C, B * HW), f32),
        grid=(B // NB,),
        in_specs=[
            pl.BlockSpec((C, N), lambda g: (0, g)),           # x (NB images / step)
            pl.BlockSpec((C, 4), const),                      # merged per-channel params
            pl.BlockSpec((C, C), const),                      # GN group membership
            pl.BlockSpec((9, N), const),                      # tap boundary masks
            pl.BlockSpec((2 * ups, up_c), const),             # squeeze1 | squeeze2
            pl.BlockSpec((C, 9 * ups), const),                # GWC (+PWC1) im2col weight
            pl.BlockSpec((C - lows, lows), const),            # PWC2
        ],
        out_specs=pl.BlockSpec((C, N), lambda g: (0, g)),
        compiler_params=pltpu.CompilerParams(
            dimension_semantics=("parallel",)),
    )(x_cn, pp, grp, tap_mask, w_sq, wg_flat, w_pwc2)
    return out.reshape(C, B, HW).transpose(1, 0, 2).reshape(B, C, H, W)


# ---------------------------------------------------------------------------
# Deterministic synthetic parameters (shapes follow ScConv.__init__)
# ---------------------------------------------------------------------------
def init_params(key, op_channel=32, squeeze_radio=2, group_size=2):
    up_c = op_channel // 2
    low_c = op_channel - up_c
    ups = up_c // squeeze_radio
    lows = low_c // squeeze_radio
    ks = jax.random.split(key, 7)
    w = lambda k, shape, fan_in: (jax.random.normal(k, shape, jnp.float32)
                                  / jnp.sqrt(float(fan_in)))
    return {
        "gn_gamma": jax.random.normal(ks[0], (op_channel,), jnp.float32),
        "gn_beta": jnp.zeros((op_channel,), jnp.float32),
        "w_sq1": w(ks[1], (ups, up_c), up_c),                          # 1x1, no bias
        "w_sq2": w(ks[2], (lows, low_c), low_c),                       # 1x1, no bias
        "w_gwc": w(ks[3], (op_channel, ups // group_size, 3, 3),       # grouped 3x3
                   9 * (ups // group_size)),
        "b_gwc": 0.1 * jax.random.normal(ks[4], (op_channel,), jnp.float32),
        "w_pwc1": w(ks[5], (op_channel, ups), ups),                    # 1x1, no bias
        "w_pwc2": w(ks[6], (op_channel - lows, lows), lows),           # 1x1, no bias
    }


# ---------------------------------------------------------------------------
# Pure-JAX reference mirroring the PyTorch graph (for validation)
# ---------------------------------------------------------------------------
def scconv_reference(params, x, *, group_num=16, gate_treshold=0.5,
                     squeeze_radio=2, group_size=2):
    B, C, H, W = x.shape
    x = x.astype(jnp.float32)
    # SRU / GroupBatchnorm2d (unbiased std, /(std+eps))
    xg = x.reshape(B, group_num, -1)
    mean = jnp.mean(xg, axis=2, keepdims=True)
    cen = xg - mean
    std = jnp.sqrt(jnp.sum(cen * cen, axis=2, keepdims=True) / (xg.shape[2] - 1))
    xn = (cen / (std + _GN_EPS)).reshape(B, C, H, W)
    gamma = params["gn_gamma"].reshape(1, C, 1, 1)
    beta = params["gn_beta"].reshape(1, C, 1, 1)
    gn_x = xn * gamma + beta
    w_gamma = jax.nn.softmax(params["gn_gamma"]).reshape(1, C, 1, 1)
    rw = jax.nn.sigmoid(gn_x * w_gamma)
    info = (w_gamma > gate_treshold).astype(jnp.float32)
    x1 = info * rw * x
    x2 = (1.0 - info) * rw * x
    h = C // 2
    x_sru = jnp.concatenate([x1[:, :h] + x2[:, h:], x1[:, h:] + x2[:, :h]], axis=1)

    # CRU
    up_c = C // 2
    conv1x1 = lambda z, w: jnp.einsum("bchw,oc->bohw", z, w,
                                      precision=jax.lax.Precision.HIGHEST)
    up = conv1x1(x_sru[:, :up_c], params["w_sq1"])
    low = conv1x1(x_sru[:, up_c:], params["w_sq2"])
    gwc = jax.lax.conv_general_dilated(
        up, jnp.transpose(params["w_gwc"], (2, 3, 1, 0)),
        window_strides=(1, 1), padding=((1, 1), (1, 1)),
        dimension_numbers=("NCHW", "HWIO", "NCHW"),
        feature_group_count=group_size,
        precision=jax.lax.Precision.HIGHEST)
    y1 = gwc + params["b_gwc"].reshape(1, C, 1, 1) + conv1x1(up, params["w_pwc1"])
    y2 = jnp.concatenate([conv1x1(low, params["w_pwc2"]), low], axis=1)
    out = jnp.concatenate([y1, y2], axis=1)
    sm = jax.nn.softmax(jnp.mean(out, axis=(2, 3), keepdims=True), axis=1)
    out = sm * out
    return out[:, :C] + out[:, C:]


# ---------------------------------------------------------------------------
if __name__ == "__main__":
    key = jax.random.PRNGKey(0)
    k_x, k_p = jax.random.split(key)
    B, C, H, W = 2, 32, 16, 16          # op_channel must be >= group_num (16)
    x = jax.random.normal(k_x, (B, C, H, W), jnp.float32)
    params = init_params(k_p, op_channel=C)

    out = jax.jit(scconv_forward)(params, x)
    out = jax.block_until_ready(out)
    assert out.shape == (B, C, H, W), out.shape

    ref = scconv_reference(params, x)
    err = float(jnp.max(jnp.abs(out - ref)))
    if not err < 1e-3:
        raise SystemExit(f"numerical mismatch vs reference: max abs err = {err}")
    print("KERNEL_OK")
</pallas_src>

<mosaic_0001>
module attributes {stable_mosaic.version = 11 : i64} {
  func.func @_scconv_kernel(%arg0: i32, %arg1: memref<32x512xf32, #tpu.memory_space<vmem>>, %arg2: memref<32x4xf32, #tpu.memory_space<vmem>>, %arg3: memref<32x32xf32, #tpu.memory_space<vmem>>, %arg4: memref<9x512xf32, #tpu.memory_space<vmem>>, %arg5: memref<16x16xf32, #tpu.memory_space<vmem>>, %arg6: memref<32x72xf32, #tpu.memory_space<vmem>>, %arg7: memref<24x8xf32, #tpu.memory_space<vmem>>, %arg8: memref<32x512xf32, #tpu.memory_space<vmem>>) attributes {dimension_semantics = [#tpu.dimension_semantics<parallel>], iteration_bounds = array<i64: 1>, scalar_prefetch = 0 : i64, scratch_operands = 0 : i64, tpu.core_type = #tpu.core_type<tc>, window_params = [{transform_indices = @transform_0, window_bounds = array<i64: 32, 512>}, {pipeline_mode = #tpu.pipeline_mode<synchronous>, transform_indices = @transform_1, window_bounds = array<i64: 32, 4>}, {pipeline_mode = #tpu.pipeline_mode<synchronous>, transform_indices = @transform_2, window_bounds = array<i64: 32, 32>}, {pipeline_mode = #tpu.pipeline_mode<synchronous>, transform_indices = @transform_3, window_bounds = array<i64: 9, 512>}, {pipeline_mode = #tpu.pipeline_mode<synchronous>, transform_indices = @transform_4, window_bounds = array<i64: 16, 16>}, {pipeline_mode = #tpu.pipeline_mode<synchronous>, transform_indices = @transform_5, window_bounds = array<i64: 32, 72>}, {pipeline_mode = #tpu.pipeline_mode<synchronous>, transform_indices = @transform_6, window_bounds = array<i64: 24, 8>}, {transform_indices = @transform_7, window_bounds = array<i64: 32, 512>}]} {
    %c0 = arith.constant 0 : index
    %c0_0 = arith.constant 0 : index
    %0 = vector.load %arg1[%c0, %c0_0] : memref<32x512xf32, #tpu.memory_space<vmem>>, vector<32x512xf32>
    %c0_1 = arith.constant 0 : index
    %c0_2 = arith.constant 0 : index
    %1 = vector.load %arg2[%c0_1, %c0_2] : memref<32x4xf32, #tpu.memory_space<vmem>>, vector<32x4xf32>
    %2 = vector.extract_strided_slice %1 {offsets = [0, 0], sizes = [32, 1], strides = [1, 1]} : vector<32x4xf32> to vector<32x1xf32>
    %3 = vector.extract_strided_slice %1 {offsets = [0, 1], sizes = [32, 1], strides = [1, 1]} : vector<32x4xf32> to vector<32x1xf32>
    %4 = vector.extract_strided_slice %1 {offsets = [0, 2], sizes = [32, 1], strides = [1, 1]} : vector<32x4xf32> to vector<32x1xf32>
    %5 = vector.extract_strided_slice %1 {offsets = [0, 3], sizes = [32, 1], strides = [1, 1]} : vector<32x4xf32> to vector<32x1xf32>
    %c0_3 = arith.constant 0 : index
    %c0_4 = arith.constant 0 : index
    %6 = vector.load %arg3[%c0_3, %c0_4] : memref<32x32xf32, #tpu.memory_space<vmem>>, vector<32x32xf32>
    %7 = vector.extract_strided_slice %0 {offsets = [0, 0], sizes = [32, 256], strides = [1, 1]} : vector<32x512xf32> to vector<32x256xf32>
    %cst = arith.constant dense<0.000000e+00> : vector<32xf32>
    %8 = vector.multi_reduction <add>, %7, %cst [1] : vector<32x256xf32> to vector<32xf32>
    %9 = vector.shape_cast %8 : vector<32xf32> to vector<32x1xf32>
    %10 = vector.extract_strided_slice %0 {offsets = [0, 256], sizes = [32, 256], strides = [1, 1]} : vector<32x512xf32> to vector<32x256xf32>
    %cst_5 = arith.constant dense<0.000000e+00> : vector<32xf32>
    %11 = vector.multi_reduction <add>, %10, %cst_5 [1] : vector<32x256xf32> to vector<32xf32>
    %12 = vector.shape_cast %11 : vector<32xf32> to vector<32x1xf32>
    %13 = tpu.concatenate %9, %12 in 1 : vector<32x1xf32>, vector<32x1xf32> -> vector<32x2xf32>
    %cst_6 = arith.constant dense<0.000000e+00> : vector<32x2xf32>
    %14 = tpu.matmul %6, %13, %cst_6 {dimension_numbers = #tpu.dot_dimension_numbers<[1], [0], [0], [1], [0, 0, 1, 1], [], []>} : vector<32x32xf32>, vector<32x2xf32>, vector<32x2xf32> -> vector<32x2xf32>
    %cst_7 = arith.constant 0.001953125 : f32
    %15 = vector.broadcast %cst_7 : f32 to vector<32x2xf32>
    %16 = arith.mulf %14, %15 : vector<32x2xf32>
    %17 = vector.extract_strided_slice %16 {offsets = [0, 0], sizes = [32, 1], strides = [1, 1]} : vector<32x2xf32> to vector<32x1xf32>
    %18 = vector.shape_cast %17 : vector<32x1xf32> to vector<32x1xf32>
    %19 = vector.broadcast %18 : vector<32x1xf32> to vector<32x256xf32>
    %20 = vector.extract_strided_slice %16 {offsets = [0, 1], sizes = [32, 1], strides = [1, 1]} : vector<32x2xf32> to vector<32x1xf32>
    %21 = vector.shape_cast %20 : vector<32x1xf32> to vector<32x1xf32>
    %22 = vector.broadcast %21 : vector<32x1xf32> to vector<32x256xf32>
    %23 = tpu.concatenate %19, %22 in 1 : vector<32x256xf32>, vector<32x256xf32> -> vector<32x512xf32>
    %24 = arith.subf %0, %23 : vector<32x512xf32>
    %25 = arith.mulf %24, %24 : vector<32x512xf32>
    %26 = vector.extract_strided_slice %25 {offsets = [0, 0], sizes = [32, 256], strides = [1, 1]} : vector<32x512xf32> to vector<32x256xf32>
    %cst_8 = arith.constant dense<0.000000e+00> : vector<32xf32>
    %27 = vector.multi_reduction <add>, %26, %cst_8 [1] : vector<32x256xf32> to vector<32xf32>
    %28 = vector.shape_cast %27 : vector<32xf32> to vector<32x1xf32>
    %29 = vector.extract_strided_slice %25 {offsets = [0, 256], sizes = [32, 256], strides = [1, 1]} : vector<32x512xf32> to vector<32x256xf32>
    %cst_9 = arith.constant dense<0.000000e+00> : vector<32xf32>
    %30 = vector.multi_reduction <add>, %29, %cst_9 [1] : vector<32x256xf32> to vector<32xf32>
    %31 = vector.shape_cast %30 : vector<32xf32> to vector<32x1xf32>
    %32 = tpu.concatenate %28, %31 in 1 : vector<32x1xf32>, vector<32x1xf32> -> vector<32x2xf32>
    %cst_10 = arith.constant dense<0.000000e+00> : vector<32x2xf32>
    %33 = tpu.matmul %6, %32, %cst_10 {dimension_numbers = #tpu.dot_dimension_numbers<[1], [0], [0], [1], [0, 0, 1, 1], [], []>} : vector<32x32xf32>, vector<32x2xf32>, vector<32x2xf32> -> vector<32x2xf32>
    %cst_11 = arith.constant 0.00195694715 : f32
    %34 = vector.broadcast %cst_11 : f32 to vector<32x2xf32>
    %35 = arith.mulf %33, %34 : vector<32x2xf32>
    %36 = math.sqrt %35 : vector<32x2xf32>
    %cst_12 = arith.constant 1.000000e-10 : f32
    %37 = vector.broadcast %cst_12 : f32 to vector<32x2xf32>
    %38 = arith.addf %36, %37 : vector<32x2xf32>
    %cst_13 = arith.constant 1.000000e+00 : f32
    %39 = vector.broadcast %cst_13 : f32 to vector<32x2xf32>
    %40 = arith.divf %39, %38 : vector<32x2xf32>
    %41 = vector.broadcast %2 : vector<32x1xf32> to vector<32x2xf32>
    %42 = arith.mulf %40, %41 : vector<32x2xf32>
    %43 = vector.extract_strided_slice %42 {offsets = [0, 0], sizes = [32, 1], strides = [1, 1]} : vector<32x2xf32> to vector<32x1xf32>
    %44 = vector.shape_cast %43 : vector<32x1xf32> to vector<32x1xf32>
    %45 = vector.broadcast %44 : vector<32x1xf32> to vector<32x256xf32>
    %46 = vector.extract_strided_slice %42 {offsets = [0, 1], sizes = [32, 1], strides = [1, 1]} : vector<32x2xf32> to vector<32x1xf32>
    %47 = vector.shape_cast %46 : vector<32x1xf32> to vector<32x1xf32>
    %48 = vector.broadcast %47 : vector<32x1xf32> to vector<32x256xf32>
    %49 = tpu.concatenate %45, %48 in 1 : vector<32x256xf32>, vector<32x256xf32> -> vector<32x512xf32>
    %50 = arith.mulf %24, %49 : vector<32x512xf32>
    %51 = vector.broadcast %3 : vector<32x1xf32> to vector<32x512xf32>
    %52 = arith.addf %50, %51 : vector<32x512xf32>
    %cst_14 = arith.constant 0.000000e+00 : f32
    %53 = vector.broadcast %cst_14 : f32 to vector<32x512xf32>
    %54 = arith.subf %53, %52 : vector<32x512xf32>
    %55 = math.exp %54 : vector<32x512xf32>
    %cst_15 = arith.constant 1.000000e+00 : f32
    %56 = vector.broadcast %cst_15 : f32 to vector<32x512xf32>
    %57 = arith.addf %56, %55 : vector<32x512xf32>
    %58 = tpu.reciprocal %57 {approx = true} : vector<32x512xf32> -> vector<32x512xf32>
    %59 = arith.mulf %58, %0 : vector<32x512xf32>
    %60 = vector.broadcast %4 : vector<32x1xf32> to vector<32x512xf32>
    %61 = arith.mulf %60, %59 : vector<32x512xf32>
    %62 = arith.subf %59, %61 : vector<32x512xf32>
    %63 = vector.extract_strided_slice %61 {offsets = [0, 0], sizes = [16, 512], strides = [1, 1]} : vector<32x512xf32> to vector<16x512xf32>
    %64 = vector.extract_strided_slice %62 {offsets = [16, 0], sizes = [16, 512], strides = [1, 1]} : vector<32x512xf32> to vector<16x512xf32>
    %65 = arith.addf %63, %64 : vector<16x512xf32>
    %66 = vector.extract_strided_slice %61 {offsets = [16, 0], sizes = [16, 512], strides = [1, 1]} : vector<32x512xf32> to vector<16x512xf32>
    %67 = vector.extract_strided_slice %62 {offsets = [0, 0], sizes = [16, 512], strides = [1, 1]} : vector<32x512xf32> to vector<16x512xf32>
    %68 = arith.addf %66, %67 : vector<16x512xf32>
    %c0_16 = arith.constant 0 : index
    %c0_17 = arith.constant 0 : index
    %69 = vector.load %arg5[%c0_16, %c0_17] : memref<16x16xf32, #tpu.memory_space<vmem>>, vector<16x16xf32>
    %70 = vector.extract_strided_slice %69 {offsets = [0, 0], sizes = [8, 16], strides = [1, 1]} : vector<16x16xf32> to vector<8x16xf32>
    %cst_18 = arith.constant dense<0.000000e+00> : vector<8x512xf32>
    %71 = tpu.matmul %70, %65, %cst_18 {dimension_numbers = #tpu.dot_dimension_numbers<[1], [0], [0], [1], [0, 0, 1, 1], [], []>} : vector<8x16xf32>, vector<16x512xf32>, vector<8x512xf32> -> vector<8x512xf32>
    %72 = vector.extract_strided_slice %69 {offsets = [8, 0], sizes = [8, 16], strides = [1, 1]} : vector<16x16xf32> to vector<8x16xf32>
    %cst_19 = arith.constant dense<0.000000e+00> : vector<8x512xf32>
    %73 = tpu.matmul %72, %68, %cst_19 {dimension_numbers = #tpu.dot_dimension_numbers<[1], [0], [0], [1], [0, 0, 1, 1], [], []>} : vector<8x16xf32>, vector<16x512xf32>, vector<8x512xf32> -> vector<8x512xf32>
    %c0_20 = arith.constant 0 : index
    %c0_21 = arith.constant 0 : index
    %74 = vector.load %arg4[%c0_20, %c0_21] : memref<9x512xf32, #tpu.memory_space<vmem>>, vector<9x512xf32>
    %c17_i32 = arith.constant 17 : i32
    %75 = tpu.dynamic_rotate %71 by %c17_i32 dim 1 : vector<8x512xf32>, i32 -> vector<8x512xf32>
    %76 = vector.extract_strided_slice %74 {offsets = [0, 0], sizes = [1, 512], strides = [1, 1]} : vector<9x512xf32> to vector<1x512xf32>
    %77 = vector.broadcast %76 : vector<1x512xf32> to vector<8x512xf32>
    %78 = arith.mulf %75, %77 : vector<8x512xf32>
    %c16_i32 = arith.constant 16 : i32
    %79 = tpu.dynamic_rotate %71 by %c16_i32 dim 1 : vector<8x512xf32>, i32 -> vector<8x512xf32>
    %80 = vector.extract_strided_slice %74 {offsets = [1, 0], sizes = [1, 512], strides = [1, 1]} : vector<9x512xf32> to vector<1x512xf32>
    %81 = vector.broadcast %80 : vector<1x512xf32> to vector<8x512xf32>
    %82 = arith.mulf %79, %81 : vector<8x512xf32>
    %c15_i32 = arith.constant 15 : i32
    %83 = tpu.dynamic_rotate %71 by %c15_i32 dim 1 : vector<8x512xf32>, i32 -> vector<8x512xf32>
    %84 = vector.extract_strided_slice %74 {offsets = [2, 0], sizes = [1, 512], strides = [1, 1]} : vector<9x512xf32> to vector<1x512xf32>
    %85 = vector.broadcast %84 : vector<1x512xf32> to vector<8x512xf32>
    %86 = arith.mulf %83, %85 : vector<8x512xf32>
    %c1_i32 = arith.constant 1 : i32
    %87 = tpu.dynamic_rotate %71 by %c1_i32 dim 1 : vector<8x512xf32>, i32 -> vector<8x512xf32>
    %88 = vector.extract_strided_slice %74 {offsets = [3, 0], sizes = [1, 512], strides = [1, 1]} : vector<9x512xf32> to vector<1x512xf32>
    %89 = vector.broadcast %88 : vector<1x512xf32> to vector<8x512xf32>
    %90 = arith.mulf %87, %89 : vector<8x512xf32>
    %c511_i32 = arith.constant 511 : i32
    %91 = tpu.dynamic_rotate %71 by %c511_i32 dim 1 : vector<8x512xf32>, i32 -> vector<8x512xf32>
    %92 = vector.extract_strided_slice %74 {offsets = [5, 0], sizes = [1, 512], strides = [1, 1]} : vector<9x512xf32> to vector<1x512xf32>
    %93 = vector.broadcast %92 : vector<1x512xf32> to vector<8x512xf32>
    %94 = arith.mulf %91, %93 : vector<8x512xf32>
    %c497_i32 = arith.constant 497 : i32
    %95 = tpu.dynamic_rotate %71 by %c497_i32 dim 1 : vector<8x512xf32>, i32 -> vector<8x512xf32>
    %96 = vector.extract_strided_slice %74 {offsets = [6, 0], sizes = [1, 512], strides = [1, 1]} : vector<9x512xf32> to vector<1x512xf32>
    %97 = vector.broadcast %96 : vector<1x512xf32> to vector<8x512xf32>
    %98 = arith.mulf %95, %97 : vector<8x512xf32>
    %c496_i32 = arith.constant 496 : i32
    %99 = tpu.dynamic_rotate %71 by %c496_i32 dim 1 : vector<8x512xf32>, i32 -> vector<8x512xf32>
    %100 = vector.extract_strided_slice %74 {offsets = [7, 0], sizes = [1, 512], strides = [1, 1]} : vector<9x512xf32> to vector<1x512xf32>
    %101 = vector.broadcast %100 : vector<1x512xf32> to vector<8x512xf32>
    %102 = arith.mulf %99, %101 : vector<8x512xf32>
    %c495_i32 = arith.constant 495 : i32
    %103 = tpu.dynamic_rotate %71 by %c495_i32 dim 1 : vector<8x512xf32>, i32 -> vector<8x512xf32>
    %104 = vector.extract_strided_slice %74 {offsets = [8, 0], sizes = [1, 512], strides = [1, 1]} : vector<9x512xf32> to vector<1x512xf32>
    %105 = vector.broadcast %104 : vector<1x512xf32> to vector<8x512xf32>
    %106 = arith.mulf %103, %105 : vector<8x512xf32>
    %107 = tpu.concatenate %78, %82, %86, %90, %71, %94, %98, %102, %106 in 0 : vector<8x512xf32>, vector<8x512xf32>, vector<8x512xf32>, vector<8x512xf32>, vector<8x512xf32>, vector<8x512xf32>, vector<8x512xf32>, vector<8x512xf32>, vector<8x512xf32> -> vector<72x512xf32>
    %c0_22 = arith.constant 0 : index
    %c0_23 = arith.constant 0 : index
    %108 = vector.load %arg6[%c0_22, %c0_23] : memref<32x72xf32, #tpu.memory_space<vmem>>, vector<32x72xf32>
    %cst_24 = arith.constant dense<0.000000e+00> : vector<32x512xf32>
    %109 = tpu.matmul %108, %107, %cst_24 {dimension_numbers = #tpu.dot_dimension_numbers<[1], [0], [0], [1], [0, 0, 1, 1], [], []>} : vector<32x72xf32>, vector<72x512xf32>, vector<32x512xf32> -> vector<32x512xf32>
    %110 = vector.broadcast %5 : vector<32x1xf32> to vector<32x512xf32>
    %111 = arith.addf %109, %110 : vector<32x512xf32>
    %c0_25 = arith.constant 0 : index
    %c0_26 = arith.constant 0 : index
    %112 = vector.load %arg7[%c0_25, %c0_26] : memref<24x8xf32, #tpu.memory_space<vmem>>, vector<24x8xf32>
    %cst_27 = arith.constant dense<0.000000e+00> : vector<24x512xf32>
    %113 = tpu.matmul %112, %73, %cst_27 {dimension_numbers = #tpu.dot_dimension_numbers<[1], [0], [0], [1], [0, 0, 1, 1], [], []>} : vector<24x8xf32>, vector<8x512xf32>, vector<24x512xf32> -> vector<24x512xf32>
    %114 = tpu.concatenate %111, %113, %73 in 0 : vector<32x512xf32>, vector<24x512xf32>, vector<8x512xf32> -> vector<64x512xf32>
    %115 = vector.extract_strided_slice %114 {offsets = [0, 0], sizes = [64, 256], strides = [1, 1]} : vector<64x512xf32> to vector<64x256xf32>
    %cst_28 = arith.constant dense<0.000000e+00> : vector<64xf32>
    %116 = vector.multi_reduction <add>, %115, %cst_28 [1] : vector<64x256xf32> to vector<64xf32>
    %117 = vector.shape_cast %116 : vector<64xf32> to vector<64x1xf32>
    %118 = vector.extract_strided_slice %114 {offsets = [0, 256], sizes = [64, 256], strides = [1, 1]} : vector<64x512xf32> to vector<64x256xf32>
    %cst_29 = arith.constant dense<0.000000e+00> : vector<64xf32>
    %119 = vector.multi_reduction <add>, %118, %cst_29 [1] : vector<64x256xf32> to vector<64xf32>
    %120 = vector.shape_cast %119 : vector<64xf32> to vector<64x1xf32>
    %121 = tpu.concatenate %117, %120 in 1 : vector<64x1xf32>, vector<64x1xf32> -> vector<64x2xf32>
    %cst_30 = arith.constant 3.906250e-03 : f32
    %122 = vector.broadcast %cst_30 : f32 to vector<64x2xf32>
    %123 = arith.mulf %121, %122 : vector<64x2xf32>
    %cst_31 = arith.constant dense<0xFF800000> : vector<2xf32>
    %124 = vector.multi_reduction <maximumf>, %123, %cst_31 [0] : vector<64x2xf32> to vector<2xf32>
    %125 = vector.shape_cast %124 : vector<2xf32> to vector<1x2xf32>
    %126 = vector.broadcast %125 : vector<1x2xf32> to vector<64x2xf32>
    %127 = arith.subf %123, %126 : vector<64x2xf32>
    %128 = math.exp %127 : vector<64x2xf32>
    %cst_32 = arith.constant dense<0.000000e+00> : vector<2xf32>
    %129 = vector.multi_reduction <add>, %128, %cst_32 [0] : vector<64x2xf32> to vector<2xf32>
    %130 = vector.shape_cast %129 : vector<2xf32> to vector<1x2xf32>
    %131 = tpu.reciprocal %130 {approx = true} : vector<1x2xf32> -> vector<1x2xf32>
    %132 = vector.broadcast %131 : vector<1x2xf32> to vector<64x2xf32>
    %133 = arith.mulf %128, %132 : vector<64x2xf32>
    %134 = vector.extract_strided_slice %133 {offsets = [0, 0], sizes = [64, 1], strides = [1, 1]} : vector<64x2xf32> to vector<64x1xf32>
    %135 = vector.shape_cast %134 : vector<64x1xf32> to vector<64x1xf32>
    %136 = vector.broadcast %135 : vector<64x1xf32> to vector<64x256xf32>
    %137 = vector.extract_strided_slice %133 {offsets = [0, 1], sizes = [64, 1], strides = [1, 1]} : vector<64x2xf32> to vector<64x1xf32>
    %138 = vector.shape_cast %137 : vector<64x1xf32> to vector<64x1xf32>
    %139 = vector.broadcast %138 : vector<64x1xf32> to vector<64x256xf32>
    %140 = tpu.concatenate %136, %139 in 1 : vector<64x256xf32>, vector<64x256xf32> -> vector<64x512xf32>
    %141 = arith.mulf %140, %114 : vector<64x512xf32>
    %142 = vector.extract_strided_slice %141 {offsets = [0, 0], sizes = [32, 512], strides = [1, 1]} : vector<64x512xf32> to vector<32x512xf32>
    %143 = vector.extract_strided_slice %141 {offsets = [32, 0], sizes = [32, 512], strides = [1, 1]} : vector<64x512xf32> to vector<32x512xf32>
    %144 = arith.addf %142, %143 : vector<32x512xf32>
    %c0_33 = arith.constant 0 : index
    %c0_34 = arith.constant 0 : index
    %145 = vector.load %arg8[%c0_33, %c0_34] : memref<32x512xf32, #tpu.memory_space<vmem>>, vector<32x512xf32>
    tpu.vector_store %arg8[%c0_33, %c0_34], %144 {strides = array<i32>} : memref<32x512xf32, #tpu.memory_space<vmem>>, vector<32x512xf32>,
    return
  }
  func.func @transform_0(%arg0: i32) -> (i32, i32) {
    %c0_i32 = arith.constant 0 : i32
    %c0_i32_0 = arith.constant 0 : i32
    return %c0_i32, %arg0 : i32, i32
  }
  func.func @transform_1(%arg0: i32) -> (i32, i32) {
    %c0_i32 = arith.constant 0 : i32
    %c0_i32_0 = arith.constant 0 : i32
    %c0_i32_1 = arith.constant 0 : i32
    return %c0_i32, %c0_i32_0 : i32, i32
  }
  func.func @transform_2(%arg0: i32) -> (i32, i32) {
    %c0_i32 = arith.constant 0 : i32
    %c0_i32_0 = arith.constant 0 : i32
    %c0_i32_1 = arith.constant 0 : i32
    return %c0_i32, %c0_i32_0 : i32, i32
  }
  func.func @transform_3(%arg0: i32) -> (i32, i32) {
    %c0_i32 = arith.constant 0 : i32
    %c0_i32_0 = arith.constant 0 : i32
    %c0_i32_1 = arith.constant 0 : i32
    return %c0_i32, %c0_i32_0 : i32, i32
  }
  func.func @transform_4(%arg0: i32) -> (i32, i32) {
    %c0_i32 = arith.constant 0 : i32
    %c0_i32_0 = arith.constant 0 : i32
    %c0_i32_1 = arith.constant 0 : i32
    return %c0_i32, %c0_i32_0 : i32, i32
  }
  func.func @transform_5(%arg0: i32) -> (i32, i32) {
    %c0_i32 = arith.constant 0 : i32
    %c0_i32_0 = arith.constant 0 : i32
    %c0_i32_1 = arith.constant 0 : i32
    return %c0_i32, %c0_i32_0 : i32, i32
  }
  func.func @transform_6(%arg0: i32) -> (i32, i32) {
    %c0_i32 = arith.constant 0 : i32
    %c0_i32_0 = arith.constant 0 : i32
    %c0_i32_1 = arith.constant 0 : i32
    return %c0_i32, %c0_i32_0 : i32, i32
  }
  func.func @transform_7(%arg0: i32) -> (i32, i32) {
    %c0_i32 = arith.constant 0 : i32
    %c0_i32_0 = arith.constant 0 : i32
    return %c0_i32, %arg0 : i32, i32
  }
}

</mosaic_0001>

<bundles_post_ra>
// kernel: scconv_forward.1
= control target key start
LH: loop header
LB: loop body
LE: loop exit
PB: predicated region body
PF: predicated region fallthrough
CT: control target
= control target key end

     0   :  { %vm74_vm0 = vcmask 7168   ;;  %vm79_vm1 = vcmask 261120   ;;  %v2674_v40 = vmov 1   ;;  %v1716_v41 = vmov 0   ;;  %s1718_s12 = smov 111   ;;  %s1719_s13 = smov 1   ;;  %s2666_s0 = inlined_call_operand.vmem [shape: f32[32,512], index: 0, kind: input, shape index: {}]   ;;  %s2667_s2 = inlined_call_operand.vmem [shape: f32[32,32], index: 2, kind: input, shape index: {}]   ;;  %s2668_s1 = inlined_call_operand.vmem [shape: f32[32,4], index: 1, kind: input, shape index: {}]   ;;  %s2669_s4 = inlined_call_operand.vmem [shape: f32[16,16], index: 4, kind: input, shape index: {}]   ;;  %s2670_s3 = inlined_call_operand.vmem [shape: f32[9,512], index: 3, kind: input, shape index: {}]   ;;  %s2671_s5 = inlined_call_operand.vmem [shape: f32[32,72], index: 5, kind: input, shape index: {}]   ;;  %s2672_s6 = inlined_call_operand.vmem [shape: f32[24,8], index: 6, kind: input, shape index: {}]   ;;  %s2673_s7 = inlined_call_operand.vmem [shape: f32[32,512], index: 7, kind: output, shape index: {}]  }
   0x1   :  { %v1770_v0 = vld [vmem:[%s2666_s0 + $0x60] sm:$0xff]  ;;  %v1775_v1 = vld [vmem:[%s2666_s0 + $0x68] sm:$0xff]  ;;  %v1806_v9 = vld [vmem:[%s2666_s0 + $0x70] sm:$0xff]  ;;  %1584 = vset.pattern.permute.xlu1 %v2674_v40  ;;  %1583 = vset.pattern.permute.xlu2 %v1716_v41  ;;  %s1721_s14 = smov 113   ;;  %s1722_s15 = smov 16  }
   0x2   :  { %v1780_v2 = vld [vmem:[%s2666_s0 + $0x40] sm:$0xff]  ;;  %v59_v3 = vadd.f32 %v1775_v1, %v1770_v0  ;;  %v1787_v4 = vld [vmem:[%s2666_s0 + $0x48] sm:$0xff]  ;;  %v1811_v10 = vld [vmem:[%s2666_s0 + $0x78] sm:$0xff]  ;;  %1589 = vset.pattern.permute.xlu0 %v2674_v40  ;;  %s1723_s16 = smov 17   ;;  %s1724_s17 = smov 127  }
   0x3   :  { %v1792_v5 = vld [vmem:[%s2666_s0 + $0x20] sm:$0xff]  ;;  %v1797_v6 = vld [vmem:[%s2666_s0 + $0x28] sm:$0xff]  ;;  %v56_v7 = vadd.f32 %v1787_v4, %v1780_v2  ;;  %v1816_v11 = vld [vmem:[%s2666_s0 + $0x50] sm:$0xff]  ;;  %v71_v15 = vadd.f32 %v1811_v10, %v1806_v9 }
   0x4   :  { %v53_v8 = vadd.f32 %v1797_v6, %v1792_v5  ;;  %60 = vadd.xlane.f32.xlu0 %v59_v3  ;;  %v1821_v12 = vld [vmem:[%s2666_s0 + $0x58] sm:$0xff]  ;;  %v1826_v13 = vld [vmem:[%s2666_s0 + $0x30] sm:$0xff]  ;;  %v1842_v18 = vld [vmem:[%s2666_s0] sm:$0xff] }
   0x5   :  { %57 = vadd.xlane.f32.xlu1 %v56_v7  ;;  %v1831_v14 = vld [vmem:[%s2666_s0 + $0x38] sm:$0xff]  ;;  %v68_v16 = vadd.f32 %v1821_v12, %v1816_v11  ;;  %v1847_v19 = vld [vmem:[%s2666_s0 + $0x8] sm:$0xff]  ;;  %v1852_v20 = vld [vmem:[%s2666_s0 + $0x10] sm:$0xff] }
   0x6   :  { %54 = vadd.xlane.f32.xlu2 %v53_v8  ;;  %v65_v17 = vadd.f32 %v1831_v14, %v1826_v13  ;;  %v1857_v21 = vld [vmem:[%s2666_s0 + $0x18] sm:$0xff]  ;;  %v50_v22 = vadd.f32 %v1847_v19, %v1842_v18  ;;  %v1869_v35 = vld [vmem:[%s2667_s2] sm:$0xff]  ;;  %v1877_v37 = vld [vmem:[%s2667_s2 + $0x8] sm:$0xff] }
   0x7   :  { %v62_v23 = vadd.f32 %v1857_v21, %v1852_v20  ;;  %v1884_v38 = vld [vmem:[%s2667_s2 + $0x10] sm:$0xff]  ;;  %v1891_v39 = vld [vmem:[%s2667_s2 + $0x18] sm:$0xff]  ;;  %s1725_s2 = smov 15  }
   0xc   :  { %72 = vadd.xlane.f32.xlu0 %v71_v15 }
   0xd   :  { %69 = vadd.xlane.f32.xlu1 %v68_v16 }
   0xe   :  { %66 = vadd.xlane.f32.xlu2 %v65_v17 }
  0x14   :  { %51 = vadd.xlane.f32.xlu0 %v50_v22 }
  0x15   :  { %63 = vadd.xlane.f32.xlu1 %v62_v23 }
  0x77   :  { %v61_v24 = vpop.xlane.xlu0 %60 }
  0x78   :  { %v58_v25 = vpop.xlane.xlu1 %57 }
  0x79   :  { %v55_v26 = vpop.xlane.xlu2 %54 }
  0x7f   :  { %v73_v27 = vpop.xlane.xlu0 %72 }
  0x80   :  { %v70_v28 = vpop.xlane.xlu1 %69  ;;  %v78_v29 = vsel %vm74_vm0, %v61_v24, %v73_v27 }
  0x81   :  { %v67_v30 = vpop.xlane.xlu2 %66  ;;  %104 = vmatpush.msra.mxu0 %v78_v29  ;;  %v77_v31 = vsel %vm74_vm0, %v58_v25, %v70_v28 }
  0x82   :  { %v76_v32 = vsel %vm74_vm0, %v55_v26, %v67_v30 }
  0x83   :  { %105 = vmatpush.msra.mxu0 %v77_v31 }
  0x85   :  { %106 = vmatpush.msra.mxu0 %v76_v32 }
  0x87   :  { %v52_v33 = vpop.xlane.xlu0 %51 }
  0x88   :  { %v64_v34 = vpop.xlane.xlu1 %63 }
  0x89   :  { %v75_v36 = vsel %vm74_vm0, %v52_v33, %v64_v34 }
  0x8a   :  { %107 = vmatpush.msra.mxu0 %v75_v36 }
  0x8b   :  { %1527 = vmatmul.msk.f32.vlgmr.msra.gmra.mxu0 %vm79_vm1, %v1869_v35 }
  0x93   :  { %1528 = vmatmul.msk.f32.gmra.mxu0 %vm79_vm1, %v1877_v37 }
  0x9b   :  { %1529 = vmatmul.msk.f32.gmra.mxu0 %vm79_vm1, %v1884_v38 }
  0xa3   :  { %1530 = vmatmul.msk.f32.gmra.mxu0 %vm79_vm1, %v1891_v39 }
 0x108   :  { %v109_v42 = vpop.f32.mrf.mxu0 }
 0x109   :  { %v121_v49 = vmul.f32 0.001953125, %v109_v42 }
 0x110   :  { %v112_v43 = vpop.f32.mrf.mxu0 }
 0x111   :  { %v122_v44 = vmul.f32 0.001953125, %v112_v43 }
 0x113   :  { %150 = vperm.xlu1 %1584, %v122_v44   ;;  %132 = vperm.xlu2 %1583, %v122_v44  }
 0x118   :  { %v115_v45 = vpop.f32.mrf.mxu0 }
 0x119   :  { %v123_v46 = vmul.f32 0.001953125, %v115_v45 }
 0x11b   :  { %1585 = vset.pattern.permute.xlu1 %v1716_v41  ;;  %1586 = vset.pattern.permute.xlu2 %v2674_v40 }
 0x11c   :  { %154 = vperm.xlu2 %1586, %v123_v46   ;;  %137 = vperm.xlu1 %1585, %v123_v46  }
 0x120   :  { %v118_v47 = vpop.f32.mrf.mxu0 }
 0x121   :  { %v124_v48 = vmul.f32 0.001953125, %v118_v47 }
 0x123   :  { %158 = vperm.xlu0 %1589, %v124_v48  }
 0x124   :  { %1587 = vset.pattern.permute.xlu2 %v1716_v41  ;;  %1588 = vset.pattern.permute.xlu1 %v2674_v40 }
 0x125   :  { %146 = vperm.xlu1 %1588, %v121_v49   ;;  %142 = vperm.xlu2 %1587, %v124_v48  }
 0x12b   :  { %1591 = vset.pattern.permute.xlu0 %v1716_v41 }
 0x12d   :  { %127 = vperm.xlu2 %1587, %v121_v49   ;;  %1590 = vset.pattern.permute.xlu1 %v1716_v41 }
 0x16d   :  { %v133_v50 = vpop.permute.xlu2 %132 }
 0x16e   :  { %v1905_v51 = vsub.f32 %v1792_v5, %v133_v50  ;;  %v1908_v52 = vsub.f32 %v1797_v6, %v133_v50 }
 0x170   :  { %v181_v53 = vmul.f32 %v1905_v51, %v1905_v51  ;;  %v182_v54 = vmul.f32 %v1908_v52, %v1908_v52 }
 0x172   :  { %v196_v55 = vadd.f32 %v182_v54, %v181_v53  ;;  %v1987_v54 = vld [vmem:[%s2668_s1 + $0x8] sm:$0xff] }
 0x174   :  { %197 = vadd.xlane.f32.xlu0 %v196_v55 }
 0x176   :  { %v155_v56 = vpop.permute.xlu2 %154 }
 0x177   :  { %v1915_v57 = vsub.f32 %v1816_v11, %v155_v56  ;;  %v1918_v58 = vsub.f32 %v1821_v12, %v155_v56 }
 0x179   :  { %v187_v59 = vmul.f32 %v1915_v57, %v1915_v57  ;;  %v188_v60 = vmul.f32 %v1918_v58, %v1918_v58 }
 0x17b   :  { %v211_v61 = vadd.f32 %v188_v60, %v187_v59 }
 0x17d   :  { %212 = vadd.xlane.f32.xlu2 %v211_v61 }
 0x17f   :  { %v143_v62 = vpop.permute.xlu2 %142 }
 0x180   :  { %v1925_v63 = vsub.f32 %v1770_v0, %v143_v62  ;;  %v1928_v3 = vsub.f32 %v1775_v1, %v143_v62 }
 0x182   :  { %v189_v7 = vmul.f32 %v1925_v63, %v1925_v63  ;;  %v190_v8 = vmul.f32 %v1928_v3, %v1928_v3 }
 0x184   :  { %v202_v11 = vadd.f32 %v190_v8, %v189_v7 }
 0x185   :  { %v151_v12 = vpop.permute.xlu1 %150 }
 0x186   :  { %203 = vadd.xlane.f32.xlu0 %v202_v11  ;;  %v1945_v24 = vsub.f32 %v1826_v13, %v151_v12  ;;  %v1948_v25 = vsub.f32 %v1831_v14, %v151_v12  ;;  %v1995_v11 = vld [vmem:[%s2668_s1 + $0x18] sm:$0xff]  ;;  %v2000_v12 = vld [vmem:[%s2668_s1 + $0x10] sm:$0xff] }
 0x187   :  { %v128_v28 = vpop.permute.xlu2 %127 }
 0x188   :  { %v183_v32 = vmul.f32 %v1945_v24, %v1945_v24  ;;  %v184_v33 = vmul.f32 %v1948_v25, %v1948_v25  ;;  %v1971_v44 = vsub.f32 %v1842_v18, %v128_v28  ;;  %v1974_v45 = vsub.f32 %v1847_v19, %v128_v28 }
 0x18a   :  { %v208_v47 = vadd.f32 %v184_v33, %v183_v32  ;;  %v177_v49 = vmul.f32 %v1971_v44, %v1971_v44  ;;  %v178_v50 = vmul.f32 %v1974_v45, %v1974_v45 }
 0x18c   :  { %v193_v53 = vadd.f32 %v178_v50, %v177_v49 }
 0x18e   :  { %v138_v15 = vpop.permute.xlu1 %137 }
 0x18f   :  { %v1935_v16 = vsub.f32 %v1780_v2, %v138_v15  ;;  %v1938_v17 = vsub.f32 %v1787_v4, %v138_v15 }
 0x191   :  { %v185_v22 = vmul.f32 %v1935_v16, %v1935_v16  ;;  %v186_v23 = vmul.f32 %v1938_v17, %v1938_v17 }
 0x193   :  { %v199_v26 = vadd.f32 %v186_v23, %v185_v22 }
 0x195   :  { %200 = vadd.xlane.f32.xlu1 %v199_v26  ;;  %v159_v27 = vpop.permute.xlu0 %158 }
 0x196   :  { %v1951_v29 = vsub.f32 %v1806_v9, %v159_v27  ;;  %v1954_v30 = vsub.f32 %v1811_v10, %v159_v27  ;;  %v2009_v27 = vld [vmem:[%s2668_s1] sm:$0xff] }
 0x197   :  { %v147_v31 = vpop.permute.xlu1 %146 }
 0x198   :  { %v1961_v34 = vsub.f32 %v1852_v20, %v147_v31  ;;  %v1964_v36 = vsub.f32 %v1857_v21, %v147_v31  ;;  %v191_v42 = vmul.f32 %v1951_v29, %v1951_v29  ;;  %v192_v43 = vmul.f32 %v1954_v30, %v1954_v30 }
 0x19a   :  { %v214_v46 = vadd.f32 %v192_v43, %v191_v42  ;;  %v179_v20 = vmul.f32 %v1961_v34, %v1961_v34  ;;  %v180_v21 = vmul.f32 %v1964_v36, %v1964_v36 }
 0x19c   :  { %215 = vadd.xlane.f32.xlu2 %v214_v46  ;;  %v205_v48 = vadd.f32 %v180_v21, %v179_v20 }
 0x19d   :  { %209 = vadd.xlane.f32.xlu1 %v208_v47 }
 0x19e   :  { %206 = vadd.xlane.f32.xlu0 %v205_v48 }
 0x1a4   :  { %194 = vadd.xlane.f32.xlu2 %v193_v53 }
 0x1b2   :  { %378 = vperm.xlu0 %1591, %v2000_v12  }
 0x1b6   :  { %383 = vperm.xlu1 %1590, %v1995_v11  }
 0x1ba   :  { %1593 = vset.pattern.permute.xlu0 %v2674_v40 }
 0x1bb   :  { %447 = vperm.xlu0 %1593, %v1987_v54  }
 0x1bc   :  { %373 = vperm.xlu2 %1587, %v1987_v54  }
 0x1be   :  { %368 = vperm.xlu1 %1590, %v2009_v27  }
 0x1c6   :  { %1592 = vset.pattern.permute.xlu1 %v2674_v40 }
 0x1c7   :  { %455 = vperm.xlu1 %1592, %v1995_v11  }
 0x1cf   :  { %451 = vperm.xlu1 %1592, %v2000_v12  }
 0x1d7   :  { %1594 = vset.pattern.permute.xlu1 %v1716_v41 }
 0x1e7   :  { %v198_v55 = vpop.xlane.xlu0 %197 }
 0x1f0   :  { %v213_v56 = vpop.xlane.xlu2 %212 }
 0x1f9   :  { %v204_v60 = vpop.xlane.xlu0 %203 }
 0x208   :  { %v201_v59 = vpop.xlane.xlu1 %200 }
 0x209   :  { %v219_v8 = vsel %vm74_vm0, %v201_v59, %v213_v56 }
 0x20f   :  { %v216_v61 = vpop.xlane.xlu2 %215 }
 0x210   :  { %v220_v62 = vsel %vm74_vm0, %v204_v60, %v216_v61  ;;  %v210_v7 = vpop.xlane.xlu1 %209 }
 0x211   :  { %233 = vmatpush.msra.mxu1 %v220_v62  ;;  %v218_v15 = vsel %vm74_vm0, %v198_v55, %v210_v7  ;;  %v207_v22 = vpop.xlane.xlu0 %206 }
 0x213   :  { %234 = vmatpush.msra.mxu1 %v219_v8 }
 0x215   :  { %235 = vmatpush.msra.mxu1 %v218_v15 }
 0x217   :  { %v195_v23 = vpop.xlane.xlu2 %194 }
 0x218   :  { %v217_v26 = vsel %vm74_vm0, %v195_v23, %v207_v22 }
 0x219   :  { %236 = vmatpush.msra.mxu1 %v217_v26 }
 0x21a   :  { %1531 = vmatmul.msk.f32.vlgmr.msra.gmra.mxu1 %vm79_vm1, %v1869_v35 }
 0x222   :  { %1532 = vmatmul.msk.f32.gmra.mxu1 %vm79_vm1, %v1877_v37 }
 0x22a   :  { %1533 = vmatmul.msk.f32.gmra.mxu1 %vm79_vm1, %v1884_v38 }
 0x232   :  { %1534 = vmatmul.msk.f32.gmra.mxu1 %vm79_vm1, %v1891_v39 }
 0x297   :  { %v238_v35 = vpop.f32.mrf.mxu1 }
 0x298   :  { %v250_v28 = vmul.f32 0.0019569471, %v238_v35 }
 0x29a   :  { %1613 = vrsqrt.f32 %v250_v28  ;;  %vm261_vm2 = vcmp.eq.f32.partialorder %v250_v28, inf  ;;  %v264_v50 = vand.u32 2147483648, %v250_v28  ;;  %vm263_vm3 = vcmp.eq.f32.partialorder %v250_v28, 0.0 }
 0x29f   :  { %v241_v31 = vpop.f32.mrf.mxu1 }
 0x2a0   :  { %v1614_v32 = vpop.eup %1613  ;;  %v251_v37 = vmul.f32 0.0019569471, %v241_v31  ;;  %v2029_v31 = vpop.permute.xlu1 %383 }
 0x2a1   :  { %v255_v33 = vmul.f32 %v1614_v32, %v250_v28 }
 0x2a2   :  { %1615 = vrsqrt.f32 %v251_v37  ;;  %vm273_vm4 = vcmp.eq.f32.partialorder %v251_v37, inf  ;;  %v276_v26 = vand.u32 2147483648, %v251_v37  ;;  %vm275_vm5 = vcmp.eq.f32.partialorder %v251_v37, 0.0 }
 0x2a3   :  { %v256_v42 = vmul.f32 %v1614_v32, %v255_v33 }
 0x2a5   :  { %v257_v43 = vmul.f32 0.5, %v256_v42 }
 0x2a7   :  { %v244_v46 = vpop.f32.mrf.mxu1  ;;  %v258_v20 = vsub.f32 1.5, %v257_v43 }
 0x2a8   :  { %v1616_v38 = vpop.eup %1615  ;;  %v252_v21 = vmul.f32 0.0019569471, %v244_v46 }
 0x2a9   :  { %v267_v47 = vmul.f32 %v1616_v38, %v251_v37  ;;  %v259_v48 = vmul.f32 %v1614_v32, %v258_v20 }
 0x2aa   :  { %1617 = vrsqrt.f32 %v252_v21  ;;  %vm285_vm7 = vcmp.eq.f32.partialorder %v252_v21, inf  ;;  %vm287_vm9 = vcmp.eq.f32.partialorder %v252_v21, 0.0 }
 0x2ab   :  { %v268_v39 = vmul.f32 %v1616_v38, %v267_v47  ;;  %v260_v49 = vmul.f32 %v259_v48, %v250_v28 }
 0x2ad   :  { %v269_v53 = vmul.f32 0.5, %v268_v39  ;;  %v262_v55 = vsel %vm261_vm2, %v250_v28, %v260_v49 }
 0x2ae   :  { %v265_v56 = vsel %vm263_vm3, %v264_v50, %v262_v55 }
 0x2af   :  { %v270_v59 = vsub.f32 1.5, %v269_v53  ;;  %v247_v60 = vpop.f32.mrf.mxu1  ;;  %v302_v61 = vadd.f32 1e-10, %v265_v56 }
 0x2b0   :  { %v1618_v62 = vpop.eup %1617  ;;  %v2026_v7 = vmul.f32 0.0019569471, %v247_v60 }
 0x2b1   :  { %v271_v8 = vmul.f32 %v1616_v38, %v270_v59  ;;  %v279_v15 = vmul.f32 %v1618_v62, %v252_v21  ;;  %1619 = vrcp.f32 %v302_v61  ;;  %v317_v49 = vand.u32 2147483648, %v302_v61 }
 0x2b2   :  { %1621 = vrsqrt.f32 %v2026_v7  ;;  %v315_v53 = vand.u32 2147483647, %v302_v61  ;;  %vm311_vm8 = vweird.f32 %v302_v61  ;;  %vm297_vm12 = vcmp.eq.f32.partialorder %v2026_v7, inf }
 0x2b3   :  { %v272_v22 = vmul.f32 %v271_v8, %v251_v37  ;;  %v280_v23 = vmul.f32 %v1618_v62, %v279_v15  ;;  %vm299_vm14 = vcmp.eq.f32.partialorder %v2026_v7, 0.0 }
 0x2b4   :  { %vm316_vm11 = vcmp.eq.f32.partialorder %v315_v53, 8.507059e+37 }
 0x2b5   :  { %v281_v35 = vmul.f32 0.5, %v280_v23  ;;  %v274_v28 = vsel %vm273_vm4, %v251_v37, %v272_v22  ;;  %v288_v37 = vand.u32 2147483648, %v252_v21  ;;  %v369_v22 = vpop.permute.xlu1 %368  ;;  %v318_v23 = vor.u32 1.1754944e-38, %v317_v49 }
 0x2b6   :  { %v277_v32 = vsel %vm275_vm5, %v276_v26, %v274_v28 }
 0x2b7   :  { %v1620_v33 = vpop.eup %1619  ;;  %v303_v42 = vadd.f32 1e-10, %v277_v32  ;;  %v282_v43 = vsub.f32 1.5, %v281_v35 }
 0x2b8   :  { %v1622_v46 = vpop.eup %1621  ;;  %v307_v20 = vmul.f32 %v1620_v33, %v302_v61  ;;  %vm312_vm6 = vweird.f32 %v1620_v33 }
 0x2b9   :  { %v291_v38 = vmul.f32 %v1622_v46, %v2026_v7  ;;  %1623 = vrcp.f32 %v303_v42  ;;  %v283_v48 = vmul.f32 %v1618_v62, %v282_v43  ;;  %vm313_vm10 = vmor %vm311_vm8, %vm312_vm6  ;;  %vm326_vm15 = vweird.f32 %v303_v42 }
 0x2ba   :  { %v308_v47 = vsub.f32 1.0, %v307_v20 }
 0x2bb   :  { %v292_v39 = vmul.f32 %v1622_v46, %v291_v38  ;;  %v284_v55 = vmul.f32 %v283_v48, %v252_v21 }
 0x2bc   :  { %v309_v50 = vmul.f32 %v1620_v33, %v308_v47 }
 0x2bd   :  { %v293_v56 = vmul.f32 0.5, %v292_v39  ;;  %v286_v60 = vsel %vm285_vm7, %v252_v21, %v284_v55  ;;  %v300_v21 = vand.u32 2147483648, %v2026_v7 }
 0x2be   :  { %v310_v59 = vadd.f32 %v1620_v33, %v309_v50  ;;  %v289_v26 = vsel %vm287_vm9, %v288_v37, %v286_v60  ;;  %v374_v37 = vpop.permute.xlu2 %373 }
 0x2bf   :  { %v1624_v8 = vpop.eup %1623  ;;  %v294_v15 = vsub.f32 1.5, %v293_v56  ;;  %v304_v28 = vadd.f32 1e-10, %v289_v26 }
 0x2c0   :  { %v314_v62 = vsel %vm313_vm10, %v1620_v33, %v310_v59  ;;  %v322_v35 = vmul.f32 %v1624_v8, %v303_v42  ;;  %vm327_vm13 = vweird.f32 %v1624_v8  ;;  %v332_v33 = vand.u32 2147483648, %v303_v42 }
 0x2c1   :  { %v295_v32 = vmul.f32 %v1622_v46, %v294_v15  ;;  %v319_v43 = vsel %vm316_vm11, %v318_v23, %v314_v62  ;;  %1625 = vrcp.f32 %v304_v28  ;;  %v330_v46 = vand.u32 2147483647, %v303_v42  ;;  %vm328_vm1 = vmor %vm326_vm15, %vm327_vm13 }
 0x2c2   :  { %v2032_v20 = vmul.f32 %v369_v22, %v319_v43  ;;  %v323_v38 = vsub.f32 1.0, %v322_v35  ;;  %v333_v56 = vor.u32 1.1754944e-38, %v332_v33  ;;  %v347_v23 = vand.u32 2147483648, %v304_v28 }
 0x2c3   :  { %v296_v61 = vmul.f32 %v295_v32, %v2026_v7  ;;  %vm331_vm2 = vcmp.eq.f32.partialorder %v330_v46, 8.507059e+37  ;;  %vm341_vm4 = vweird.f32 %v304_v28  ;;  %v379_v32 = vpop.permute.xlu0 %378  ;;  %vm636_vm11 = vcmask 130048  }
 0x2c4   :  { %392 = vperm.xlu2 %1587, %v2032_v20   ;;  %v324_v47 = vmul.f32 %v1624_v8, %v323_v38 }
 0x2c5   :  { %v298_v48 = vsel %vm297_vm12, %v2026_v7, %v296_v61  ;;  %v345_v7 = vand.u32 2147483647, %v304_v28 }
 0x2c6   :  { %v301_v39 = vsel %vm299_vm14, %v300_v21, %v298_v48  ;;  %v325_v49 = vadd.f32 %v1624_v8, %v324_v47 }
 0x2c7   :  { %v305_v50 = vadd.f32 1e-10, %v301_v39  ;;  %v1626_v53 = vpop.eup %1625  ;;  %vm346_vm6 = vcmp.eq.f32.partialorder %v345_v7, 8.507059e+37 }
 0x2c8   :  { %v329_v55 = vsel %vm328_vm1, %v1624_v8, %v325_v49  ;;  %v337_v60 = vmul.f32 %v1626_v53, %v304_v28  ;;  %vm342_vm3 = vweird.f32 %v1626_v53  ;;  %v348_v8 = vor.u32 1.1754944e-38, %v347_v23 }
 0x2c9   :  { %1627 = vrcp.f32 %v305_v50  ;;  %v334_v59 = vsel %vm331_vm2, %v333_v56, %v329_v55  ;;  %vm343_vm5 = vmor %vm341_vm4, %vm342_vm3  ;;  %v362_v61 = vand.u32 2147483648, %v305_v50  ;;  %v360_v33 = vand.u32 2147483647, %v305_v50 }
 0x2ca   :  { %v387_v15 = vmul.f32 %v374_v37, %v334_v59  ;;  %v338_v22 = vsub.f32 1.0, %v337_v60  ;;  %vm356_vm8 = vweird.f32 %v305_v50  ;;  %v1717_v55 = vmov 2  }
 0x2cb   :  { %v363_v28 = vor.u32 1.1754944e-38, %v362_v61  ;;  %vm361_vm10 = vcmp.eq.f32.partialorder %v360_v33, 8.507059e+37 }
 0x2cc   :  { %397 = vperm.xlu1 %1594, %v387_v15   ;;  %v339_v26 = vmul.f32 %v1626_v53, %v338_v22 }
 0x2ce   :  { %v340_v42 = vadd.f32 %v1626_v53, %v339_v26 }
 0x2cf   :  { %v1628_v62 = vpop.eup %1627 }
 0x2d0   :  { %v352_v35 = vmul.f32 %v1628_v62, %v305_v50  ;;  %v344_v38 = vsel %vm343_vm5, %v1626_v53, %v340_v42  ;;  %vm357_vm7 = vweird.f32 %v1628_v62  ;;  %vm1001_vm5 = vcmask 588800  }
 0x2d1   :  { %v349_v21 = vsel %vm346_vm6, %v348_v8, %v344_v38  ;;  %vm358_vm9 = vmor %vm356_vm8, %vm357_vm7  ;;  %vm1133_vm6 = vcmask 64512   ;;  %vm1311_vm7 = vcmask 15360  }
 0x2d2   :  { %v353_v43 = vsub.f32 1.0, %v352_v35  ;;  %v388_v48 = vmul.f32 %v379_v32, %v349_v21 }
 0x2d4   :  { %v354_v47 = vmul.f32 %v1628_v62, %v353_v43  ;;  %1596 = vset.pattern.permute.xlu1 %v2674_v40  ;;  %419 = vperm.xlu0 %1593, %v388_v48  }
 0x2d5   :  { %402 = vperm.xlu2 %1587, %v388_v48  }
 0x2d6   :  { %v355_v46 = vadd.f32 %v1628_v62, %v354_v47 }
 0x2d8   :  { %v359_v39 = vsel %vm358_vm9, %v1628_v62, %v355_v46 }
 0x2d9   :  { %v364_v49 = vsel %vm361_vm10, %v363_v28, %v359_v39 }
 0x2da   :  { %v389_v53 = vmul.f32 %v2029_v31, %v364_v49  ;;  %v2049_v31 = vpop.permute.xlu1 %455 }
 0x2dc   :  { %423 = vperm.xlu1 %1596, %v389_v53   ;;  %1598 = vset.pattern.permute.xlu0 %v1717_v55 }
 0x2dd   :  { %407 = vperm.xlu2 %1587, %v389_v53   ;;  %575 = vperm.xlu0 %1598, %v1987_v54  }
 0x2e4   :  { %411 = vperm.xlu1 %1596, %v2032_v20   ;;  %v452_v20 = vpop.permute.xlu1 %451 }
 0x2e5   :  { %1595 = vset.pattern.permute.xlu2 %v2674_v40 }
 0x2e6   :  { %443 = vperm.xlu2 %1595, %v2009_v27  }
 0x2ec   :  { %1599 = vset.pattern.permute.xlu1 %v1717_v55 }
 0x2ed   :  { %579 = vperm.xlu1 %1599, %v2000_v12  }
 0x2ee   :  { %415 = vperm.xlu2 %1595, %v387_v15  }
 0x2f6   :  { %1597 = vset.pattern.permute.xlu2 %v1717_v55 }
 0x2f7   :  { %583 = vperm.xlu2 %1597, %v1995_v11  }
 0x2ff   :  { %571 = vperm.xlu2 %1597, %v2009_v27  }
 0x31e   :  { %v393_v50 = vpop.permute.xlu2 %392 }
 0x31f   :  { %v426_v38 = vmul.f32 %v393_v50, %v1971_v44  ;;  %v427_v33 = vmul.f32 %v393_v50, %v1974_v45 }
 0x32f   :  { %v403_v56 = vpop.permute.xlu2 %402 }
 0x330   :  { %v434_v37 = vmul.f32 %v403_v56, %v1935_v16  ;;  %v435_v59 = vmul.f32 %v403_v56, %v1938_v17  ;;  %v448_v16 = vpop.permute.xlu0 %447 }
 0x332   :  { %v466_v60 = vadd.f32 %v452_v20, %v434_v37  ;;  %v467_v22 = vadd.f32 %v452_v20, %v435_v59 }
 0x334   :  { %v482_v23 = vsub.f32 0.0, %v466_v60  ;;  %v483_v62 = vsub.f32 0.0, %v467_v22 }
 0x336   :  { %v506_v32 = vmul.f32 1.442695, %v482_v23  ;;  %v508_v17 = vmul.f32 1.442695, %v483_v62 }
 0x337   :  { %v408_v26 = vpop.permute.xlu2 %407 }
 0x338   :  { %v438_v15 = vmul.f32 %v408_v26, %v1925_v63  ;;  %v439_v7 = vmul.f32 %v408_v26, %v1928_v3  ;;  %1629 = vpow2.f32 %v506_v32 }
 0x33a   :  { %v470_v35 = vadd.f32 %v2049_v31, %v438_v15  ;;  %v471_v42 = vadd.f32 %v2049_v31, %v439_v7 }
 0x33c   :  { %v486_v8 = vsub.f32 0.0, %v470_v35  ;;  %v487_v43 = vsub.f32 0.0, %v471_v42 }
 0x33e   :  { %v514_v61 = vmul.f32 1.442695, %v486_v8  ;;  %v398_v21 = vpop.permute.xlu1 %397  ;;  %v516_v47 = vmul.f32 1.442695, %v487_v43 }
 0x33f   :  { %v430_v63 = vmul.f32 %v398_v21, %v1905_v51  ;;  %v431_v3 = vmul.f32 %v398_v21, %v1908_v52  ;;  %v1630_v51 = vpop.eup %1629 }
 0x340   :  { %1631 = vpow2.f32 %v514_v61  ;;  %v2061_v48 = vpop.permute.xlu2 %443  ;;  %v530_v35 = vadd.f32 1.0, %v1630_v51 }
 0x341   :  { %v462_v46 = vadd.f32 %v448_v16, %v430_v63  ;;  %v463_v28 = vadd.f32 %v448_v16, %v431_v3  ;;  %v458_v39 = vadd.f32 %v2061_v48, %v426_v38  ;;  %1633 = vpow2.f32 %v508_v17 }
 0x342   :  { %v459_v44 = vadd.f32 %v2061_v48, %v427_v33  ;;  %1635 = vpow2.f32 %v516_v47 }
 0x343   :  { %v478_v49 = vsub.f32 0.0, %v462_v46  ;;  %v479_v53 = vsub.f32 0.0, %v463_v28  ;;  %v474_v55 = vsub.f32 0.0, %v458_v39 }
 0x344   :  { %v475_v56 = vsub.f32 0.0, %v459_v44 }
 0x345   :  { %v498_v37 = vmul.f32 1.442695, %v478_v49  ;;  %v500_v52 = vmul.f32 1.442695, %v479_v53  ;;  %v490_v45 = vmul.f32 1.442695, %v474_v55 }
 0x346   :  { %v1632_v59 = vpop.eup %1631  ;;  %v492_v60 = vmul.f32 1.442695, %v475_v56  ;;  %v420_v22 = vpop.permute.xlu0 %419 }
 0x347   :  { %v534_v50 = vadd.f32 1.0, %v1632_v59  ;;  %1637 = vpow2.f32 %v498_v37  ;;  %v1634_v23 = vpop.eup %1633  ;;  %v436_v26 = vmul.f32 %v420_v22, %v1915_v57  ;;  %v437_v15 = vmul.f32 %v420_v22, %v1918_v58 }
 0x348   :  { %1639 = vpow2.f32 %v500_v52  ;;  %v416_v7 = vpop.permute.xlu2 %415  ;;  %v1636_v62 = vpop.eup %1635  ;;  %v531_v17 = vadd.f32 1.0, %v1634_v23 }
 0x349   :  { %1641 = vrcp.f32 %v534_v50  ;;  %v432_v42 = vmul.f32 %v416_v7, %v1945_v24  ;;  %v433_v32 = vmul.f32 %v416_v7, %v1948_v25  ;;  %v535_v8 = vadd.f32 1.0, %v1636_v62 }
 0x34a   :  { %1643 = vpow2.f32 %v490_v45  ;;  %v468_v43 = vadd.f32 %v452_v20, %v436_v26  ;;  %v469_v38 = vadd.f32 %v452_v20, %v437_v15 }
 0x34b   :  { %1645 = vpow2.f32 %v492_v60  ;;  %v464_v61 = vadd.f32 %v448_v16, %v432_v42  ;;  %v465_v21 = vadd.f32 %v448_v16, %v433_v32 }
 0x34c   :  { %1647 = vrcp.f32 %v535_v8  ;;  %v484_v57 = vsub.f32 0.0, %v468_v43  ;;  %v485_v47 = vsub.f32 0.0, %v469_v38 }
 0x34d   :  { %v1638_v58 = vpop.eup %1637  ;;  %1649 = vrcp.f32 %v530_v35  ;;  %v480_v24 = vsub.f32 0.0, %v464_v61  ;;  %v481_v20 = vsub.f32 0.0, %v465_v21 }
 0x34e   :  { %v424_v63 = vpop.permute.xlu1 %423  ;;  %v1640_v3 = vpop.eup %1639  ;;  %v526_v33 = vadd.f32 1.0, %v1638_v58  ;;  %v510_v46 = vmul.f32 1.442695, %v484_v57  ;;  %1651 = vrcp.f32 %v531_v17  ;;  %v512_v16 = vmul.f32 1.442695, %v485_v47 }
 0x34f   :  { %v440_v25 = vmul.f32 %v424_v63, %v1951_v29  ;;  %v1642_v28 = vpop.eup %1641  ;;  %v527_v39 = vadd.f32 1.0, %v1640_v3  ;;  %v441_v44 = vmul.f32 %v424_v63, %v1954_v30  ;;  %v502_v59 = vmul.f32 1.442695, %v480_v24  ;;  %v2082_v32 = vpop.permute.xlu0 %575 }
 0x350   :  { %v1644_v49 = vpop.eup %1643  ;;  %1653 = vrcp.f32 %v526_v33  ;;  %v566_v37 = vmul.f32 %v1642_v28, %v1770_v0  ;;  %v504_v60 = vmul.f32 1.442695, %v481_v20 }
 0x351   :  { %v472_v53 = vadd.f32 %v2049_v31, %v440_v25  ;;  %v1646_v55 = vpop.eup %1645  ;;  %1655 = vrcp.f32 %v527_v39  ;;  %v522_v56 = vadd.f32 1.0, %v1644_v49  ;;  %v473_v51 = vadd.f32 %v2049_v31, %v441_v44  ;;  %v2074_v50 = vpop.permute.xlu2 %583 }
 0x352   :  { %v1648_v52 = vpop.eup %1647  ;;  %v523_v29 = vadd.f32 1.0, %v1646_v55  ;;  %1657 = vpow2.f32 %v510_v46  ;;  %v2078_v0 = vmul.f32 %v2074_v50, %v566_v37 }
 0x353   :  { %v488_v45 = vsub.f32 0.0, %v472_v53  ;;  %v1650_v30 = vpop.eup %1649  ;;  %1659 = vrcp.f32 %v522_v56  ;;  %v489_v22 = vsub.f32 0.0, %v473_v51  ;;  %v567_v23 = vmul.f32 %v1648_v52, %v1775_v1 }
 0x354   :  { %1661 = vrcp.f32 %v523_v29  ;;  %v1652_v15 = vpop.eup %1651  ;;  %v562_v20 = vmul.f32 %v1650_v30, %v1780_v2 }
 0x355   :  { %v518_v26 = vmul.f32 1.442695, %v488_v45  ;;  %1663 = vpow2.f32 %v512_v16  ;;  %v520_v31 = vmul.f32 1.442695, %v489_v22  ;;  %v2088_v43 = vmul.f32 %v2074_v50, %v567_v23 }
 0x356   :  { %v412_v7 = vpop.permute.xlu1 %411  ;;  %v1654_v62 = vpop.eup %1653  ;;  %1665 = vpow2.f32 %v502_v59  ;;  %v563_v56 = vmul.f32 %v1652_v15, %v1787_v4 }
 0x357   :  { %v428_v35 = vmul.f32 %v412_v7, %v1961_v34  ;;  %v429_v42 = vmul.f32 %v412_v7, %v1964_v36  ;;  %v1656_v8 = vpop.eup %1655  ;;  %1667 = vpow2.f32 %v504_v60  ;;  %v2085_v1 = vmul.f32 %v1654_v62, %v1792_v5 }
 0x358   :  { %v1658_v38 = vpop.eup %1657  ;;  %1669 = vpow2.f32 %v518_v26  ;;  %v2093_v34 = vmul.f32 %v1656_v8, %v1797_v6  ;;  %v614_v5 = vsub.f32 %v566_v37, %v2078_v0  ;;  %v615_v6 = vsub.f32 %v567_v23, %v2088_v43  ;;  %v2139_v23 = vld [vmem:[%s2669_s4] sm:$0xff] }
 0x359   :  { %v460_v17 = vadd.f32 %v2061_v48, %v428_v35  ;;  %v461_v61 = vadd.f32 %v2061_v48, %v429_v42  ;;  %v1660_v36 = vpop.eup %1659  ;;  %1671 = vpow2.f32 %v520_v31  ;;  %v2097_v21 = vmul.f32 %v2082_v32, %v2085_v1  ;;  %v2111_v16 = vpop.permute.xlu2 %571 }
 0x35a   :  { %v1662_v57 = vpop.eup %1661  ;;  %v532_v47 = vadd.f32 1.0, %v1658_v38  ;;  %v2102_v58 = vmul.f32 %v2082_v32, %v2093_v34  ;;  %v2108_v39 = vmul.f32 %v1660_v36, %v1842_v18 }
 0x35b   :  { %v1664_v63 = vpop.eup %1663  ;;  %v476_v3 = vsub.f32 0.0, %v460_v17  ;;  %v622_v48 = vadd.f32 %v614_v5, %v2097_v21  ;;  %v477_v46 = vsub.f32 0.0, %v461_v61  ;;  %v2116_v55 = vmul.f32 %v1662_v57, %v1847_v19 }
 0x35c   :  { %v1666_v33 = vpop.eup %1665  ;;  %v623_v28 = vadd.f32 %v615_v6, %v2102_v58  ;;  %1673 = vrcp.f32 %v532_v47  ;;  %v533_v45 = vadd.f32 1.0, %v1664_v63  ;;  %v2127_v19 = vmul.f32 %v2111_v16, %v2108_v39 }
 0x35d   :  { %v1668_v24 = vpop.eup %1667  ;;  %v528_v25 = vadd.f32 1.0, %v1666_v33  ;;  %654 = vmatpush.msra.mxu2 %v622_v48  ;;  %v494_v52 = vmul.f32 1.442695, %v476_v3  ;;  %v496_v29 = vmul.f32 1.442695, %v477_v46  ;;  %v2132_v30 = vmul.f32 %v2111_v16, %v2116_v55  ;;  %v1712_v46 = vld [vmem:[%s2666_s0 + $0x58] sm:$0xff] }
 0x35e   :  { %v1670_v44 = vpop.eup %1669  ;;  %v529_v49 = vadd.f32 1.0, %v1668_v24  ;;  %674 = vmatpush.msra.mxu3 %v623_v28 }
 0x35f   :  { %v2113_v53 = vpop.permute.xlu1 %579  ;;  %v1672_v51 = vpop.eup %1671  ;;  %1675 = vrcp.f32 %v528_v25  ;;  %v536_v37 = vadd.f32 1.0, %v1670_v44  ;;  %v1713_v44 = vld [vmem:[%s2666_s0 + $0x10] sm:$0xff] }
 0x360   :  { %v2120_v18 = vmul.f32 %v2113_v53, %v562_v20  ;;  %1677 = vrcp.f32 %v529_v49  ;;  %v537_v2 = vadd.f32 1.0, %v1672_v51  ;;  %v2123_v59 = vmul.f32 %v2113_v53, %v563_v56  ;;  %v1714_v51 = vld [vmem:[%s2666_s0 + $0x18] sm:$0xff] }
 0x361   :  { %1679 = vrcp.f32 %v536_v37 }
 0x362   :  { %v610_v4 = vsub.f32 %v562_v20, %v2120_v18  ;;  %1681 = vrcp.f32 %v537_v2  ;;  %v611_v60 = vsub.f32 %v563_v56, %v2123_v59  ;;  %v1674_v26 = vpop.eup %1673  ;;  %v606_v56 = vsub.f32 %v2085_v1, %v2097_v21 }
 0x363   :  { %1683 = vpow2.f32 %v494_v52  ;;  %v607_v52 = vsub.f32 %v2093_v34, %v2102_v58  ;;  %v602_v1 = vsub.f32 %v2108_v39, %v2127_v19 }
 0x364   :  { %v618_v22 = vadd.f32 %v610_v4, %v2127_v19  ;;  %1685 = vpow2.f32 %v496_v29  ;;  %v619_v15 = vadd.f32 %v611_v60, %v2132_v30  ;;  %v630_v60 = vadd.f32 %v606_v56, %v2078_v0 }
 0x365   :  { %v1676_v31 = vpop.eup %1675  ;;  %1687 = vrcp.f32 %v533_v45 }
 0x366   :  { %655 = vmatpush.msra.mxu2 %v618_v22  ;;  %v1678_v7 = vpop.eup %1677  ;;  %675 = vmatpush.msra.mxu3 %v619_v15  ;;  %v560_v42 = vmul.f32 %v1676_v31, %v1826_v13  ;;  %v631_v22 = vadd.f32 %v607_v52, %v2088_v43 }
 0x367   :  { %1535 = vmatmul.msk.f32.vlgmr.msra.gmra.mxu2 %vm636_vm11, %v2139_v23  ;;  %v1680_v62 = vpop.eup %1679  ;;  %1536 = vmatmul.msk.f32.vlgmr.msra.gmra.mxu3 %vm636_vm11, %v2139_v23  ;;  %v561_v17 = vmul.f32 %v1678_v7, %v1831_v14 }
 0x368   :  { %v1682_v35 = vpop.eup %1681  ;;  %v568_v8 = vmul.f32 %v1680_v62, %v1806_v9  ;;  %v592_v48 = vmul.f32 %v2082_v32, %v560_v42 }
 0x369   :  { %v1684_v38 = vpop.eup %1683  ;;  %v569_v61 = vmul.f32 %v1682_v35, %v1811_v10  ;;  %v593_v9 = vmul.f32 %v2082_v32, %v561_v17  ;;  %v1711_v10 = vld [vmem:[%s2666_s0 + $0x50] sm:$0xff] }
 0x36a   :  { %v1686_v36 = vpop.eup %1685  ;;  %v524_v5 = vadd.f32 1.0, %v1684_v38  ;;  %v600_v57 = vmul.f32 %v2074_v50, %v568_v8  ;;  %v564_v14 = vmul.f32 %v1711_v10, %v1674_v26  ;;  %v603_v26 = vsub.f32 %v2116_v55, %v2132_v30 }
 0x36b   :  { %v1688_v47 = vpop.eup %1687  ;;  %v525_v63 = vadd.f32 1.0, %v1686_v36  ;;  %v601_v3 = vmul.f32 %v2074_v50, %v569_v61  ;;  %v608_v15 = vsub.f32 %v560_v42, %v592_v48  ;;  %v609_v58 = vsub.f32 %v561_v17, %v593_v9 }
 0x36c   :  { %1689 = vrcp.f32 %v524_v5  ;;  %v616_v6 = vsub.f32 %v568_v8, %v600_v57  ;;  %v565_v24 = vmul.f32 %v1712_v46, %v1688_v47  ;;  %v596_v25 = vmul.f32 %v2113_v53, %v564_v14  ;;  %v2272_v46 = vld [vmem:[%s2670_s3 + $0x10] sm:$0xff] }
 0x36d   :  { %1691 = vrcp.f32 %v525_v63  ;;  %v617_v13 = vsub.f32 %v569_v61, %v601_v3  ;;  %v627_v0 = vadd.f32 %v603_v26, %v2123_v59  ;;  %v632_v39 = vadd.f32 %v608_v15, %v600_v57 }
 0x36e   :  { %v624_v33 = vadd.f32 %v616_v6, %v592_v48  ;;  %v597_v32 = vmul.f32 %v2113_v53, %v565_v24  ;;  %v612_v53 = vsub.f32 %v564_v14, %v596_v25  ;;  %v633_v43 = vadd.f32 %v609_v58, %v601_v3  ;;  %v1609_v6 = vld [vmem:[%s2670_s3 + $0x30] ss:$0 sm:$0xff] }
 0x36f   :  { %v625_v50 = vadd.f32 %v617_v13, %v593_v9  ;;  %v819_v57 = vlaneseq  ;;  %v1726_v3 = vmov 3   ;;  %v1610_v9 = vld [vmem:[%s2670_s3 + $0x38] ss:$0 sm:$0xff] }
 0x370   :  { %694 = vmatpush.msrb.mxu2 %v624_v33  ;;  %v613_v45 = vsub.f32 %v565_v24, %v597_v32  ;;  %1600 = vset.pattern.permute.xlu0 %v1726_v3 }
 0x371   :  { %714 = vmatpush.msrb.mxu3 %v625_v50  ;;  %1601 = vset.pattern.permute.xlu1 %v1726_v3  ;;  %v2251_v48 = vand.u32 127, %v819_v57  ;;  %v954_v50 = vperm.slane %v2272_v46, 7 }
 0x372   :  { %v1690_v28 = vpop.eup %1689  ;;  %1602 = vset.pattern.permute.xlu2 %v1726_v3 }
 0x373   :  { %v1692_v20 = vpop.eup %1691  ;;  %v556_v49 = vmul.f32 %v1713_v44, %v1690_v28  ;;  %vm968_vm12 = vcmp.lt.s32.totalorder %v2251_v48, 111  ;;  %v2288_v28 = vld [vmem:[%s2670_s3] sm:$0xff]  ;;  %vm947_vm13 = vcmp.lt.s32.totalorder %v2251_v48, 112  ;;  %v1612_v44 = vld [vmem:[%s2670_s3 + $0x28] ss:$0 sm:$0xff]  ;;  %vm926_vm14 = vcmp.lt.s32.totalorder %v2251_v48, 113 }
 0x374   :  { %v557_v37 = vmul.f32 %v1714_v51, %v1692_v20  ;;  %v1611_v20 = vld [vmem:[%s2670_s3 + $0x20] ss:$0 sm:$0xff]  ;;  %v952_v51 = vperm.slane %v2288_v28, 7  ;;  %v931_v26 = vperm.slane %v2288_v28, 6  ;;  %vm905_vm15 = vcmp.lt.s32.totalorder %v2251_v48, 127 }
 0x375   :  { %v588_v2 = vmul.f32 %v2111_v16, %v556_v49  ;;  %vm884_vm1 = vcmp.lt.s32.totalorder %v2251_v48, 1  ;;  %vm863_vm2 = vcmp.lt.s32.totalorder %v2251_v48, 15  ;;  %vm842_vm3 = vcmp.lt.s32.totalorder %v2251_v48, 16 }
 0x376   :  { %v589_v29 = vmul.f32 %v2111_v16, %v557_v37  ;;  %v626_v16 = vadd.f32 %v602_v1, %v2120_v18  ;;  %v635_v18 = vld [vmem:[%s2669_s4 + $0x8] sm:$0xff]  ;;  %s1720_s4 = smov 112   ;;  %vm821_vm4 = vcmp.lt.s32.totalorder %v2251_v48, 17  ;;  %v984_v48 = vld [vmem:[%s2671_s5 + $0x18] sm:$0xff] }
 0x377   :  { %v620_v4 = vadd.f32 %v612_v53, %v588_v2  ;;  %v604_v34 = vsub.f32 %v556_v49, %v588_v2 }
 0x378   :  { %v621_v21 = vadd.f32 %v613_v45, %v589_v29  ;;  %v605_v31 = vsub.f32 %v557_v37, %v589_v29 }
 0x379   :  { %695 = vmatpush.msrb.mxu2 %v620_v4  ;;  %v628_v55 = vadd.f32 %v604_v34, %v596_v25 }
 0x37a   :  { %715 = vmatpush.msrb.mxu3 %v621_v21  ;;  %1537 = vmatmul.msk.f32.vlgmr.msrb.gmra.mxu2 %vm636_vm11, %v2139_v23  ;;  %v629_v19 = vadd.f32 %v605_v31, %v597_v32  ;;  %v2294_v32 = vld [vmem:[%s2670_s3 + $0x8] sm:$0xff]  ;;  %v933_v31 = vperm.slane %v2272_v46, 6 }
 0x37b   :  { %737 = vmatpush.msra.mxu2 %v630_v60  ;;  %1538 = vmatmul.msk.f32.vlgmr.msrb.gmra.mxu3 %vm636_vm11, %v2139_v23  ;;  %v953_v53 = vperm.slane %v2294_v32, 7  ;;  %v932_v15 = vperm.slane %v2294_v32, 6 }
 0x37c   :  { %757 = vmatpush.msra.mxu3 %v631_v22 }
 0x37d   :  { %738 = vmatpush.msra.mxu2 %v626_v16 }
 0x37e   :  { %758 = vmatpush.msra.mxu3 %v627_v0 }
 0x37f   :  { %777 = vmatpush.msrb.mxu2 %v632_v39 }
 0x380   :  { %797 = vmatpush.msrb.mxu3 %v633_v43 }
 0x381   :  { %778 = vmatpush.msrb.mxu2 %v628_v55 }
 0x382   :  { %798 = vmatpush.msrb.mxu3 %v629_v19  ;;  %1539 = vmatmul.msk.f32.vlgmr.msra.gmra.mxu2 %vm636_vm11, %v635_v18 }
 0x383   :  { %1540 = vmatmul.msk.f32.vlgmr.msra.gmra.mxu3 %vm636_vm11, %v635_v18 }
 0x38a   :  { %1541 = vmatmul.msk.f32.vlgmr.msrb.gmra.mxu2 %vm636_vm11, %v635_v18 }
 0x38b   :  { %1542 = vmatmul.msk.f32.vlgmr.msrb.gmra.mxu3 %vm636_vm11, %v635_v18 }
 0x3ea   :  { %v2193_v59 = vpop.f32.mrf.mxu2  ;;  %v2195_v30 = vpop.f32.mrf.mxu3 }
 0x3eb   :  { %960 = vrot.lane.b32.xlu1 %v2193_v59, %s1718_s12  ;;  %878 = vrot.lane.b32.xlu0 %v2195_v30, %s1719_s13 }
 0x3ec   :  { %941 = vrot.lane.b32.xlu2 %v2195_v30, %s1720_s4 }
 0x3f3   :  { %939 = vrot.lane.b32.xlu1 %v2193_v59, %s1720_s4  ;;  %920 = vrot.lane.b32.xlu0 %v2195_v30, %s1721_s14 }
 0x3f4   :  { %836 = vrot.lane.b32.xlu2 %v2195_v30, %s1722_s15 }
 0x3fb   :  { %918 = vrot.lane.b32.xlu1 %v2193_v59, %s1721_s14 }
 0x3fc   :  { %813 = vrot.lane.b32.xlu2 %v2195_v30, %s1723_s16 }
 0x3fd   :  { %v2210_v7 = vpop.f32.mrf.mxu2 }
 0x3fe   :  { %v2207_v23 = vpop.f32.mrf.mxu3 }
 0x3ff   :  { %966 = vrot.lane.b32.xlu0 %v2207_v23, %s1718_s12 }
 0x403   :  { %897 = vrot.lane.b32.xlu1 %v2193_v59, %s1724_s17 }
 0x404   :  { %964 = vrot.lane.b32.xlu2 %v2210_v7, %s1718_s12 }
 0x407   :  { %945 = vrot.lane.b32.xlu0 %v2207_v23, %s1720_s4 }
 0x40b   :  { %962 = vrot.lane.b32.xlu1 %v2195_v30, %s1718_s12 }
 0x40c   :  { %943 = vrot.lane.b32.xlu2 %v2210_v7, %s1720_s4 }
 0x40f   :  { %924 = vrot.lane.b32.xlu0 %v2207_v23, %s1721_s14 }
 0x413   :  { %857 = vrot.lane.b32.xlu1 %v2195_v30, %s1725_s2 }
 0x414   :  { %922 = vrot.lane.b32.xlu2 %v2210_v7, %s1721_s14 }
 0x417   :  { %903 = vrot.lane.b32.xlu0 %v2207_v23, %s1724_s17 }
 0x41b   :  { %899 = vrot.lane.b32.xlu1 %v2195_v30, %s1724_s17 }
 0x41c   :  { %901 = vrot.lane.b32.xlu2 %v2210_v7, %s1724_s17 }
 0x41f   :  { %861 = vrot.lane.b32.xlu0 %v2207_v23, %s1725_s2 }
 0x423   :  { %880 = vrot.lane.b32.xlu1 %v2210_v7, %s1719_s13 }
 0x424   :  { %882 = vrot.lane.b32.xlu2 %v2207_v23, %s1719_s13 }
 0x427   :  { %838 = vrot.lane.b32.xlu0 %v2210_v7, %s1722_s15 }
 0x42b   :  { %840 = vrot.lane.b32.xlu1 %v2207_v23, %s1722_s15 }
 0x42c   :  { %859 = vrot.lane.b32.xlu2 %v2210_v7, %s1725_s2 }
 0x42f   :  { %815 = vrot.lane.b32.xlu0 %v2210_v7, %s1723_s16 }
 0x433   :  { %817 = vrot.lane.b32.xlu1 %v2207_v23, %s1723_s16 }
 0x434   :  { %876 = vrot.lane.b32.xlu2 %v2193_v59, %s1719_s13 }
 0x437   :  { %855 = vrot.lane.b32.xlu0 %v2193_v59, %s1725_s2 }
 0x43b   :  { %834 = vrot.lane.b32.xlu1 %v2193_v59, %s1722_s15 }
 0x43c   :  { %811 = vrot.lane.b32.xlu2 %v2193_v59, %s1723_s16 }
 0x43f   :  { %986 = vperm.xlu0 %1600, %v2009_v27  }
 0x443   :  { %990 = vperm.xlu1 %1601, %v1987_v54  }
 0x444   :  { %994 = vperm.xlu2 %1602, %v2000_v12   ;;  %v2277_v12 = vld [vmem:[%s2670_s3 + $0x18] sm:$0xff] }
 0x445   :  { %v955_v25 = vperm.slane %v2277_v12, 7  ;;  %v934_v16 = vperm.slane %v2277_v12, 6 }
 0x446   :  { %v942_v62 = vpop.permute.xlu2 %941 }
 0x447   :  { %1603 = vset.pattern.permute.xlu0 %v1716_v41 }
 0x44b   :  { %998 = vperm.xlu1 %1601, %v1995_v11  }
 0x44c   :  { %1605 = vset.pattern.permute.xlu2 %v1716_v41 }
 0x44e   :  { %v2241_v35 = vpop.permute.xlu2 %836 }
 0x453   :  { %1604 = vset.pattern.permute.xlu1 %v1716_v41 }
 0x456   :  { %v2243_v42 = vpop.permute.xlu2 %813 }
 0x45d   :  { %v961_v8 = vpop.permute.xlu1 %960  ;;  %v2245_v17 = vpop.permute.xlu0 %878 }
 0x45e   :  { %v965_v38 = vpop.permute.xlu2 %964 }
 0x465   :  { %v940_v61 = vpop.permute.xlu1 %939  ;;  %v921_v5 = vpop.permute.xlu0 %920 }
 0x466   :  { %v944_v36 = vpop.permute.xlu2 %943  ;;  %v950_v29 = vsel %vm947_vm13, %v940_v61, %v942_v62 }
 0x467   :  { %v949_v45 = vsel %vm947_vm13, %v942_v62, %v944_v36  ;;  %v956_v0 = vmul.f32 %v952_v51, %v950_v29  ;;  %v2358_v51 = vpop.f32.mrf.mxu2 }
 0x468   :  { %v957_v39 = vmul.f32 %v953_v53, %v949_v45 }
 0x46d   :  { %v2247_v47 = vpop.permute.xlu1 %918 }
 0x46e   :  { %v2249_v63 = vpop.permute.xlu2 %922  ;;  %v929_v34 = vsel %vm926_vm14, %v2247_v47, %v921_v5 }
 0x46f   :  { %v928_v58 = vsel %vm926_vm14, %v921_v5, %v2249_v63  ;;  %v935_v55 = vmul.f32 %v931_v26, %v929_v34  ;;  %v913_v5 = vperm.slane %v2277_v12, 5 }
 0x470   :  { %v936_v19 = vmul.f32 %v932_v15, %v928_v58  ;;  %v849_v15 = vperm.slane %v2272_v46, 1 }
 0x471   :  { %v967_v13 = vpop.permute.xlu0 %966 }
 0x472   :  { %v969_v10 = vsel %vm968_vm12, %v965_v38, %v967_v13  ;;  %v972_v54 = vsel %vm968_vm12, %v967_v13, %v961_v8 }
 0x473   :  { %v979_v27 = vmul.f32 %v1609_v6, %v969_v10  ;;  %v980_v14 = vmul.f32 %v1610_v9, %v972_v54  ;;  %v911_v6 = vperm.slane %v2294_v32, 5 }
 0x475   :  { %v2267_v33 = vpop.permute.xlu1 %897  ;;  %1108 = vmatpush.msra.mxu3 %v980_v14  ;;  %1079 = vmatpush.msra.mxu2 %v979_v27 }
 0x476   :  { %v2279_v24 = vpop.permute.xlu2 %901 }
 0x479   :  { %v946_v11 = vpop.permute.xlu0 %945 }
 0x47a   :  { %v948_v49 = vsel %vm947_vm13, %v944_v36, %v946_v11  ;;  %v951_v56 = vsel %vm947_vm13, %v946_v11, %v940_v61  ;;  %v912_v36 = vperm.slane %v2272_v46, 5  ;;  %v889_v11 = vperm.slane %v2288_v28, 3 }
 0x47b   :  { %v958_v37 = vmul.f32 %v954_v50, %v948_v49  ;;  %v959_v52 = vmul.f32 %v955_v25, %v951_v56  ;;  %v891_v49 = vperm.slane %v2272_v46, 3 }
 0x47d   :  { %v963_v2 = vpop.permute.xlu1 %962  ;;  %1080 = vmatpush.msra.mxu2 %v958_v37  ;;  %1109 = vmatpush.msra.mxu3 %v959_v52  ;;  %v870_v37 = vperm.slane %v2272_v46, 2 }
 0x47e   :  { %v970_v4 = vsel %vm968_vm12, %v963_v2, %v965_v38  ;;  %v971_v60 = vsel %vm968_vm12, %v961_v8, %v963_v2  ;;  %v2310_v1 = vpop.permute.xlu2 %882  ;;  %v871_v2 = vperm.slane %v2277_v12, 2 }
 0x47f   :  { %v977_v21 = vmul.f32 %v1611_v20, %v971_v60  ;;  %v978_v22 = vmul.f32 %v1612_v44, %v970_v4  ;;  %v890_v20 = vperm.slane %v2294_v32, 3 }
 0x481   :  { %1021 = vmatpush.msrb.mxu0 %v977_v21  ;;  %1050 = vmatpush.msrb.mxu1 %v978_v22  ;;  %v925_v43 = vpop.permute.xlu0 %924 }
 0x482   :  { %v927_v18 = vsel %vm926_vm14, %v2249_v63, %v925_v43  ;;  %v930_v41 = vsel %vm926_vm14, %v925_v43, %v2247_v47  ;;  %v910_v63 = vperm.slane %v2288_v28, 5 }
 0x483   :  { %1022 = vmatpush.msrb.mxu0 %v956_v0  ;;  %1051 = vmatpush.msrb.mxu1 %v957_v39  ;;  %v937_v62 = vmul.f32 %v933_v31, %v927_v18  ;;  %v938_v8 = vmul.f32 %v934_v16, %v930_v41  ;;  %v828_v39 = vperm.slane %v2272_v46, 0 }
 0x485   :  { %1023 = vmatpush.msrb.mxu0 %v935_v55  ;;  %v2329_v38 = vpop.permute.xlu1 %857  ;;  %1052 = vmatpush.msrb.mxu1 %v936_v19  ;;  %v829_v55 = vperm.slane %v2277_v12, 0 }
 0x486   :  { %v860_v61 = vpop.permute.xlu2 %859  ;;  %1081 = vmatpush.msra.mxu2 %v937_v62  ;;  %1110 = vmatpush.msra.mxu3 %v938_v8  ;;  %v981_v62 = vld [vmem:[%s2671_s5] sm:$0xff]  ;;  %v2397_v8 = vpop.f32.mrf.mxu2 }
 0x487   :  { %v865_v52 = vsel %vm863_vm2, %v2329_v38, %v860_v61 }
 0x488   :  { %v874_v22 = vmul.f32 %v870_v37, %v865_v52 }
 0x489   :  { %v904_v57 = vpop.permute.xlu0 %903 }
 0x48a   :  { %v906_v47 = vsel %vm905_vm15, %v2279_v24, %v904_v57  ;;  %v909_v3 = vsel %vm905_vm15, %v904_v57, %v2267_v33 }
 0x48b   :  { %v916_v9 = vmul.f32 %v912_v36, %v906_v47  ;;  %v917_v13 = vmul.f32 %v913_v5, %v909_v3  ;;  %v868_v36 = vperm.slane %v2288_v28, 2  ;;  %v869_v5 = vperm.slane %v2294_v32, 2 }
 0x48c   :  { %v847_v47 = vperm.slane %v2288_v28, 1  ;;  %v848_v3 = vperm.slane %v2294_v32, 1 }
 0x48d   :  { %v900_v10 = vpop.permute.xlu1 %899  ;;  %1082 = vmatpush.msra.mxu2 %v916_v9  ;;  %1111 = vmatpush.msra.mxu3 %v917_v13 }
 0x48e   :  { %v907_v54 = vsel %vm905_vm15, %v900_v10, %v2279_v24  ;;  %v908_v27 = vsel %vm905_vm15, %v2267_v33, %v900_v10  ;;  %v877_v14 = vpop.permute.xlu2 %876 }
 0x48f   :  { %v914_v50 = vmul.f32 %v910_v63, %v908_v27  ;;  %v915_v25 = vmul.f32 %v911_v6, %v907_v54  ;;  %1083 = vmatpush.msra.mxu2 %v2210_v7  ;;  %1112 = vmatpush.msra.mxu3 %v2207_v23  ;;  %v887_v24 = vsel %vm884_vm1, %v877_v14, %v2245_v17  ;;  %v892_v7 = vperm.slane %v2277_v12, 3 }
 0x490   :  { %v888_v33 = vsel %vm884_vm1, %v2310_v1, %v877_v14  ;;  %v894_v56 = vmul.f32 %v890_v20, %v887_v24  ;;  %v826_v27 = vperm.slane %v2288_v28, 0  ;;  %v827_v14 = vperm.slane %v2294_v32, 0 }
 0x491   :  { %1024 = vmatpush.msrb.mxu0 %v914_v50  ;;  %1053 = vmatpush.msrb.mxu1 %v915_v25  ;;  %v2352_v44 = vpop.permute.xlu0 %861  ;;  %v893_v23 = vmul.f32 %v889_v11, %v888_v33  ;;  %v982_v50 = vld [vmem:[%s2671_s5 + $0x8] sm:$0xff]  ;;  %v1130_v33 = vld [vmem:[%s2672_s6] sm:$0xff] }
 0x492   :  { %v864_v53 = vsel %vm863_vm2, %v860_v61, %v2352_v44 }
 0x493   :  { %1025 = vmatpush.msrb.mxu0 %v2193_v59  ;;  %1054 = vmatpush.msrb.mxu1 %v2195_v30  ;;  %v2368_v59 = vpop.f32.mrf.mxu3  ;;  %v875_v26 = vmul.f32 %v871_v2, %v864_v53 }
 0x494   :  { %v1268_v4 = vadd.f32 %v2368_v59, %v2358_v51 }
 0x495   :  { %v881_v29 = vpop.permute.xlu1 %880  ;;  %1026 = vmatpush.msrb.mxu0 %v893_v23  ;;  %1055 = vmatpush.msrb.mxu1 %v894_v56 }
 0x496   :  { %v885_v30 = vsel %vm884_vm1, %v881_v29, %v2310_v1  ;;  %v886_v45 = vsel %vm884_vm1, %v2245_v17, %v881_v29  ;;  %1269 = vadd.xlane.f32.xlu0 %v1268_v4  ;;  %v850_v17 = vperm.slane %v2277_v12, 1  ;;  %v812_v57 = vpop.permute.xlu2 %811 }
 0x497   :  { %v895_v60 = vmul.f32 %v891_v49, %v886_v45  ;;  %v896_v21 = vmul.f32 %v892_v7, %v885_v30  ;;  %v824_v25 = vsel %vm821_vm4, %v812_v57, %v2243_v42  ;;  %v1132_v49 = vld [vmem:[%s2672_s6 + $0x10] sm:$0xff] }
 0x499   :  { %1084 = vmatpush.msra.mxu2 %v895_v60  ;;  %1113 = vmatpush.msra.mxu3 %v896_v21  ;;  %v839_v1 = vpop.permute.xlu0 %838 }
 0x49a   :  { %v844_v34 = vsel %vm842_vm3, %v2241_v35, %v839_v1 }
 0x49b   :  { %1085 = vmatpush.msra.mxu2 %v874_v22  ;;  %1114 = vmatpush.msra.mxu3 %v875_v26  ;;  %v853_v58 = vmul.f32 %v849_v15, %v844_v34  ;;  %v2400_v12 = vpop.f32.mrf.mxu3 }
 0x49d   :  { %v841_v31 = vpop.permute.xlu1 %840  ;;  %1086 = vmatpush.msra.mxu2 %v853_v58 }
 0x49e   :  { %v843_v16 = vsel %vm842_vm3, %v839_v1, %v841_v31 }
 0x49f   :  { %v854_v0 = vmul.f32 %v850_v17, %v843_v16 }
 0x4a1   :  { %1115 = vmatpush.msra.mxu3 %v854_v0  ;;  %v816_v43 = vpop.permute.xlu0 %815  ;;  %v995_v0 = vpop.permute.xlu2 %994 }
 0x4a2   :  { %v823_v19 = vsel %vm821_vm4, %v2243_v42, %v816_v43  ;;  %v831_v42 = vmul.f32 %v827_v14, %v824_v25 }
 0x4a3   :  { %v832_v18 = vmul.f32 %v828_v39, %v823_v19 }
 0x4a5   :  { %v818_v41 = vpop.permute.xlu1 %817  ;;  %1087 = vmatpush.msra.mxu2 %v832_v18 }
 0x4a6   :  { %v822_v46 = vsel %vm821_vm4, %v816_v43, %v818_v41  ;;  %1551 = vmatmul.msk.f32.vlgmr.msra.gmra.mxu2 %vm1001_vm5, %v981_v62 }
 0x4a7   :  { %v833_v61 = vmul.f32 %v829_v55, %v822_v46  ;;  %1210 = vmatpush.msrb.mxu2 %v2397_v8 }
 0x4a9   :  { %1116 = vmatpush.msra.mxu3 %v833_v61  ;;  %v856_v63 = vpop.permute.xlu0 %855 }
 0x4aa   :  { %1555 = vmatmul.msk.f32.vlgmr.msra.gmra.mxu3 %vm1001_vm5, %v981_v62  ;;  %v866_v6 = vsel %vm863_vm2, %v856_v63, %v2329_v38  ;;  %v867_v9 = vsel %vm863_vm2, %v2352_v44, %v856_v63  ;;  %v825_v38 = vsel %vm821_vm4, %v818_v41, %v812_v57  ;;  %v1131_v44 = vld [vmem:[%s2672_s6 + $0x8] sm:$0xff] }
 0x4ab   :  { %1236 = vmatpush.msrb.mxu3 %v2400_v12  ;;  %v872_v13 = vmul.f32 %v868_v36, %v867_v9  ;;  %v873_v10 = vmul.f32 %v869_v5, %v866_v6  ;;  %v830_v24 = vmul.f32 %v826_v27, %v825_v38 }
 0x4ad   :  { %v835_v54 = vpop.permute.xlu1 %834  ;;  %1027 = vmatpush.msrb.mxu0 %v872_v13  ;;  %1056 = vmatpush.msrb.mxu1 %v873_v10 }
 0x4ae   :  { %v845_v11 = vsel %vm842_vm3, %v835_v54, %v2241_v35  ;;  %v846_v28 = vsel %vm842_vm3, %v841_v31, %v835_v54  ;;  %1552 = vmatmul.msk.f32.gmra.mxu2 %vm1001_vm5, %v982_v50  ;;  %v983_v35 = vld [vmem:[%s2671_s5 + $0x10] sm:$0xff] }
 0x4af   :  { %v851_v32 = vmul.f32 %v847_v47, %v846_v28  ;;  %v852_v20 = vmul.f32 %v848_v3, %v845_v11 }
 0x4b1   :  { %1028 = vmatpush.msrb.mxu0 %v851_v32  ;;  %1057 = vmatpush.msrb.mxu1 %v852_v20  ;;  %v987_v7 = vpop.permute.xlu0 %986 }
 0x4b2   :  { %1556 = vmatmul.msk.f32.gmra.mxu3 %vm1001_vm5, %v982_v50 }
 0x4b3   :  { %1029 = vmatpush.msrb.mxu0 %v830_v24  ;;  %1058 = vmatpush.msrb.mxu1 %v831_v42 }
 0x4b4   :  { %1543 = vmatmul.msk.f32.vlgmr.msrb.gmra.mxu0 %vm1001_vm5, %v981_v62  ;;  %1547 = vmatmul.msk.f32.vlgmr.msrb.gmra.mxu1 %vm1001_vm5, %v981_v62 }
 0x4b5   :  { %1184 = vmatpush.msra.mxu1 %v2368_v59  ;;  %1158 = vmatpush.msra.mxu0 %v2358_v51  ;;  %v991_v60 = vpop.permute.xlu1 %990 }
 0x4b6   :  { %1553 = vmatmul.msk.f32.gmra.mxu2 %vm1001_vm5, %v983_v35 }
 0x4ba   :  { %1557 = vmatmul.msk.f32.gmra.mxu3 %vm1001_vm5, %v983_v35 }
 0x4bc   :  { %1544 = vmatmul.msk.f32.gmra.mxu0 %vm1001_vm5, %v982_v50  ;;  %1548 = vmatmul.msk.f32.gmra.mxu1 %vm1001_vm5, %v982_v50 }
 0x4bd   :  { %v999_v57 = vpop.permute.xlu1 %998 }
 0x4be   :  { %1554 = vmatmul.msk.f32.gmra.mxu2 %vm1001_vm5, %v984_v48 }
 0x4c2   :  { %1558 = vmatmul.msk.f32.gmra.mxu3 %vm1001_vm5, %v984_v48 }
 0x4c4   :  { %1545 = vmatmul.msk.f32.gmra.mxu0 %vm1001_vm5, %v983_v35  ;;  %1549 = vmatmul.msk.f32.gmra.mxu1 %vm1001_vm5, %v983_v35 }
 0x4c6   :  { %1565 = vmatmul.msk.f32.vlgmr.msrb.gmra.mxu2 %vm1133_vm6, %v1130_v33 }
 0x4ca   :  { %1568 = vmatmul.msk.f32.vlgmr.msrb.gmra.mxu3 %vm1133_vm6, %v1130_v33 }
 0x4cc   :  { %1546 = vmatmul.msk.f32.gmra.mxu0 %vm1001_vm5, %v984_v48  ;;  %1550 = vmatmul.msk.f32.gmra.mxu1 %vm1001_vm5, %v984_v48 }
 0x4ce   :  { %1566 = vmatmul.msk.f32.gmra.mxu2 %vm1133_vm6, %v1131_v44 }
 0x4d2   :  { %1569 = vmatmul.msk.f32.gmra.mxu3 %vm1133_vm6, %v1131_v44 }
 0x4d4   :  { %1559 = vmatmul.msk.f32.vlgmr.msra.gmra.mxu0 %vm1133_vm6, %v1130_v33  ;;  %1562 = vmatmul.msk.f32.vlgmr.msra.gmra.mxu1 %vm1133_vm6, %v1130_v33 }
 0x4d6   :  { %1567 = vmatmul.msk.f32.gmra.mxu2 %vm1133_vm6, %v1132_v49 }
 0x4da   :  { %1570 = vmatmul.msk.f32.gmra.mxu3 %vm1133_vm6, %v1132_v49 }
 0x4dc   :  { %1560 = vmatmul.msk.f32.gmra.mxu0 %vm1133_vm6, %v1131_v44  ;;  %1563 = vmatmul.msk.f32.gmra.mxu1 %vm1133_vm6, %v1131_v44 }
 0x4e4   :  { %1561 = vmatmul.msk.f32.gmra.mxu0 %vm1133_vm6, %v1132_v49  ;;  %1564 = vmatmul.msk.f32.gmra.mxu1 %vm1133_vm6, %v1132_v49 }
 0x529   :  { %v1089_v23 = vpop.f32.mrf.mxu2 }
 0x52a   :  { %v2473_v56 = vadd.f32 %v1089_v23, %v987_v7 }
 0x52d   :  { %v1118_v37 = vpop.f32.mrf.mxu3 }
 0x52e   :  { %v2475_v52 = vadd.f32 %v1118_v37, %v987_v7 }
 0x530   :  { %v1271_v2 = vadd.f32 %v2475_v52, %v2473_v56 }
 0x531   :  { %v1031_v53 = vpop.f32.mrf.mxu0  ;;  %v1060_v29 = vpop.f32.mrf.mxu1 }
 0x532   :  { %v2479_v30 = vadd.f32 %v1031_v53, %v987_v7  ;;  %v2481_v45 = vadd.f32 %v1060_v29, %v987_v7  ;;  %1272 = vadd.xlane.f32.xlu1 %v1271_v2  ;;  %v1092_v4 = vpop.f32.mrf.mxu2  ;;  %v1292_v2 = vadd.f32 %v2400_v12, %v2397_v8  ;;  %v1270_v53 = vpop.xlane.xlu0 %1269 }
 0x533   :  { %v2485_v26 = vadd.f32 %v1092_v4, %v991_v60 }
 0x534   :  { %v1247_v21 = vadd.f32 %v2481_v45, %v2479_v30 }
 0x535   :  { %v1121_v22 = vpop.f32.mrf.mxu3 }
 0x536   :  { %1248 = vadd.xlane.f32.xlu2 %v1247_v21  ;;  %v2487_v15 = vadd.f32 %v1121_v22, %v991_v60 }
 0x538   :  { %2679 = vst [vmem:[#allocation2_spill] sm:$0xff] %v2487_v15  ;;  %v1274_v31 = vadd.f32 %v2487_v15, %v2485_v26 }
 0x539   :  { %v1034_v1 = vpop.f32.mrf.mxu0  ;;  %v1063_v17 = vpop.f32.mrf.mxu1 }
 0x53a   :  { %v2489_v34 = vadd.f32 %v1034_v1, %v991_v60  ;;  %v2491_v58 = vadd.f32 %v1063_v17, %v991_v60  ;;  %v1095_v16 = vpop.f32.mrf.mxu2 }
 0x53b   :  { %v2497_v55 = vadd.f32 %v1095_v16, %v995_v0 }
 0x53c   :  { %v1250_v39 = vadd.f32 %v2491_v58, %v2489_v34 }
 0x53d   :  { %v1124_v43 = vpop.f32.mrf.mxu3 }
 0x53e   :  { %1251 = vadd.xlane.f32.xlu0 %v1250_v39  ;;  %1275 = vadd.xlane.f32.xlu2 %v1274_v31  ;;  %v2499_v19 = vadd.f32 %v1124_v43, %v995_v0 }
 0x540   :  { %v1277_v61 = vadd.f32 %v2499_v19, %v2497_v55 }
 0x541   :  { %v1037_v18 = vpop.f32.mrf.mxu0  ;;  %v1066_v41 = vpop.f32.mrf.mxu1 }
 0x542   :  { %v2501_v62 = vadd.f32 %v1037_v18, %v995_v0  ;;  %v2503_v46 = vadd.f32 %v1066_v41, %v995_v0  ;;  %v1098_v36 = vpop.f32.mrf.mxu2 }
 0x543   :  { %v2509_v47 = vadd.f32 %v1098_v36, %v999_v57 }
 0x544   :  { %v1253_v5 = vadd.f32 %v2503_v46, %v2501_v62 }
 0x545   :  { %v1127_v63 = vpop.f32.mrf.mxu3 }
 0x546   :  { %1254 = vadd.xlane.f32.xlu1 %v1253_v5  ;;  %1278 = vadd.xlane.f32.xlu0 %v1277_v61  ;;  %v2511_v3 = vadd.f32 %v1127_v63, %v999_v57 }
 0x548   :  { %v1280_v14 = vadd.f32 %v2511_v3, %v2509_v47 }
 0x549   :  { %v1040_v6 = vpop.f32.mrf.mxu0  ;;  %v1069_v9 = vpop.f32.mrf.mxu1 }
 0x54a   :  { %v2513_v13 = vadd.f32 %v1040_v6, %v999_v57  ;;  %v2515_v10 = vadd.f32 %v1069_v9, %v999_v57  ;;  %v2517_v54 = vpop.f32.mrf.mxu2 }
 0x54c   :  { %v1256_v27 = vadd.f32 %v2515_v10, %v2513_v13 }
 0x54d   :  { %v2523_v50 = vpop.f32.mrf.mxu3 }
 0x54e   :  { %1257 = vadd.xlane.f32.xlu2 %v1256_v27  ;;  %1281 = vadd.xlane.f32.xlu1 %v1280_v14  ;;  %v1283_v28 = vadd.f32 %v2523_v50, %v2517_v54 }
 0x551   :  { %v2525_v25 = vpop.f32.mrf.mxu0  ;;  %v2527_v38 = vpop.f32.mrf.mxu1 }
 0x552   :  { %v1259_v11 = vadd.f32 %v2527_v38, %v2525_v25  ;;  %v2533_v32 = vpop.f32.mrf.mxu2 }
 0x553   :  { %2680 = vst [vmem:[#allocation3_spill] sm:$0xff] %v2533_v32 }
 0x554   :  { %1260 = vadd.xlane.f32.xlu0 %v1259_v11 }
 0x555   :  { %v2535_v20 = vpop.f32.mrf.mxu3 }
 0x556   :  { %2681 = vst [vmem:[#allocation4_spill] sm:$0xff] %v2535_v20  ;;  %1284 = vadd.xlane.f32.xlu2 %v1283_v28  ;;  %v1286_v24 = vadd.f32 %v2535_v20, %v2533_v32 }
 0x559   :  { %v2539_v42 = vpop.f32.mrf.mxu0  ;;  %v2541_v35 = vpop.f32.mrf.mxu1 }
 0x55a   :  { %v1262_v48 = vadd.f32 %v2541_v35, %v2539_v42  ;;  %v2545_v33 = vpop.f32.mrf.mxu2 }
 0x55c   :  { %1287 = vadd.xlane.f32.xlu0 %v1286_v24  ;;  %1263 = vadd.xlane.f32.xlu1 %v1262_v48 }
 0x55d   :  { %v2547_v44 = vpop.f32.mrf.mxu3 }
 0x55e   :  { %v1289_v49 = vadd.f32 %v2547_v44, %v2545_v33 }
 0x561   :  { %v2551_v7 = vpop.f32.mrf.mxu0  ;;  %v2553_v23 = vpop.f32.mrf.mxu1 }
 0x562   :  { %v1265_v37 = vadd.f32 %v2553_v23, %v2551_v7 }
 0x564   :  { %1266 = vadd.xlane.f32.xlu2 %v1265_v37  ;;  %1290 = vadd.xlane.f32.xlu1 %v1289_v49 }
 0x56c   :  { %1293 = vadd.xlane.f32.xlu2 %v1292_v2 }
 0x5a5   :  { %v1273_v4 = vpop.xlane.xlu1 %1272 }
 0x5a9   :  { %v1249_v29 = vpop.xlane.xlu2 %1248 }
 0x5aa   :  { %v1295_v6 = vsel %vm74_vm0, %v1249_v29, %v1273_v4 }
 0x5ab   :  { %v1303_v24 = vmul.f32 0.00390625, %v1295_v6 }
 0x5b1   :  { %v1252_v60 = vpop.xlane.xlu0 %1251  ;;  %v1276_v21 = vpop.xlane.xlu2 %1275 }
 0x5b2   :  { %v1296_v36 = vsel %vm74_vm0, %v1252_v60, %v1276_v21 }
 0x5b3   :  { %v1304_v14 = vmul.f32 0.00390625, %v1296_v36 }
 0x5b5   :  { %v1313_v21 = vsel %vm1311_vm7, %v1304_v14, -inf }
 0x5b9   :  { %v1255_v22 = vpop.xlane.xlu1 %1254  ;;  %v1279_v1 = vpop.xlane.xlu0 %1278 }
 0x5ba   :  { %v1297_v9 = vsel %vm74_vm0, %v1255_v22, %v1279_v1 }
 0x5bb   :  { %v1305_v48 = vmul.f32 0.00390625, %v1297_v9 }
 0x5c1   :  { %v1258_v17 = vpop.xlane.xlu2 %1257  ;;  %v1282_v31 = vpop.xlane.xlu1 %1281 }
 0x5c2   :  { %v1298_v27 = vsel %vm74_vm0, %v1258_v17, %v1282_v31  ;;  %v1312_v17 = vsel %vm1311_vm7, %v1303_v24, -inf  ;;  %v1314_v31 = vsel %vm1311_vm7, %v1305_v48, -inf }
 0x5c3   :  { %v1306_v49 = vmul.f32 0.00390625, %v1298_v27 }
 0x5c7   :  { %v1261_v16 = vpop.xlane.xlu0 %1260 }
 0x5c9   :  { %v1285_v0 = vpop.xlane.xlu2 %1284 }
 0x5ca   :  { %v1299_v5 = vsel %vm74_vm0, %v1261_v16, %v1285_v0  ;;  %v1315_v16 = vsel %vm1311_vm7, %v1306_v49, -inf }
 0x5cb   :  { %v1307_v11 = vmul.f32 0.00390625, %v1299_v5 }
 0x5cd   :  { %v1316_v29 = vsel %vm1311_vm7, %v1307_v11, -inf }
 0x5cf   :  { %v1264_v39 = vpop.xlane.xlu1 %1263  ;;  %v1288_v43 = vpop.xlane.xlu0 %1287 }
 0x5d0   :  { %v1300_v61 = vsel %vm74_vm0, %v1264_v39, %v1288_v43  ;;  %v1317_v39 = vmax.f32 %v1312_v17, %v1316_v29 }
 0x5d1   :  { %v1308_v63 = vmul.f32 0.00390625, %v1300_v61 }
 0x5d3   :  { %v1318_v37 = vsel %vm1311_vm7, %v1308_v63, -inf }
 0x5d4   :  { %v1319_v1 = vmax.f32 %v1313_v21, %v1318_v37 }
 0x5d7   :  { %v1267_v18 = vpop.xlane.xlu2 %1266  ;;  %v1291_v41 = vpop.xlane.xlu1 %1290 }
 0x5d8   :  { %v1301_v57 = vsel %vm74_vm0, %v1267_v18, %v1291_v41 }
 0x5d9   :  { %v1309_v28 = vmul.f32 0.00390625, %v1301_v57 }
 0x5db   :  { %v1320_v4 = vsel %vm1311_vm7, %v1309_v28, -inf }
 0x5dc   :  { %v1321_v43 = vmax.f32 %v1314_v31, %v1320_v4 }
 0x5df   :  { %v1294_v2 = vpop.xlane.xlu2 %1293 }
 0x5e0   :  { %v1302_v60 = vsel %vm74_vm0, %v1270_v53, %v1294_v2  ;;  %v1324_v53 = vmax.f32 %v1317_v39, %v1319_v1 }
 0x5e1   :  { %v1310_v22 = vmul.f32 0.00390625, %v1302_v60 }
 0x5e3   :  { %v1322_v0 = vsel %vm1311_vm7, %v1310_v22, -inf }
 0x5e4   :  { %v1323_v18 = vmax.f32 %v1315_v16, %v1322_v0 }
 0x5e6   :  { %v1325_v41 = vmax.f32 %v1321_v43, %v1323_v18 }
 0x5e8   :  { %v1326_v61 = vmax.f32 %v1324_v53, %v1325_v41 }
 0x5ea   :  { %v1327_v36 = vrot.slane %v1326_v61, 4 }
 0x5ec   :  { %v1328_v5 = vmax.f32 %v1326_v61, %v1327_v36 }
 0x5ee   :  { %v1329_v57 = vrot.slane %v1328_v5, 2 }
 0x5f0   :  { %v1330_v6 = vmax.f32 %v1328_v5, %v1329_v57 }
 0x5f2   :  { %v1331_v9 = vrot.slane %v1330_v6, 1 }
 0x5f4   :  { %v1332_v27 = vmax.f32 %v1330_v6, %v1331_v9 }
 0x5f6   :  { %v1333_v37 = vsub.f32 %v1303_v24, %v1332_v27  ;;  %v1334_v2 = vsub.f32 %v1304_v14, %v1332_v27  ;;  %v1335_v60 = vsub.f32 %v1305_v48, %v1332_v27  ;;  %v1336_v21 = vsub.f32 %v1306_v49, %v1332_v27 }
 0x5f7   :  { %v1337_v40 = vsub.f32 %v1307_v11, %v1332_v27  ;;  %v1338_v29 = vsub.f32 %v1308_v63, %v1332_v27  ;;  %v1339_v1 = vsub.f32 %v1309_v28, %v1332_v27  ;;  %v1340_v31 = vsub.f32 %v1310_v22, %v1332_v27 }
 0x5f8   :  { %v1341_v20 = vmul.f32 1.442695, %v1333_v37  ;;  %v1343_v32 = vmul.f32 1.442695, %v1334_v2  ;;  %v1345_v15 = vmul.f32 1.442695, %v1335_v60 }
 0x5f9   :  { %v1347_v4 = vmul.f32 1.442695, %v1336_v21  ;;  %v1349_v17 = vmul.f32 1.442695, %v1337_v40  ;;  %v1351_v16 = vmul.f32 1.442695, %v1338_v29 }
 0x5fa   :  { %1693 = vpow2.f32 %v1341_v20  ;;  %v1353_v0 = vmul.f32 1.442695, %v1339_v1  ;;  %v1355_v48 = vmul.f32 1.442695, %v1340_v31 }
 0x5fb   :  { %1695 = vpow2.f32 %v1343_v32 }
 0x5fc   :  { %1697 = vpow2.f32 %v1345_v15 }
 0x5fd   :  { %1699 = vpow2.f32 %v1347_v4 }
 0x5fe   :  { %1701 = vpow2.f32 %v1349_v17 }
 0x5ff   :  { %1703 = vpow2.f32 %v1351_v16 }
 0x600   :  { %v1694_v24 = vpop.eup %1693  ;;  %1705 = vpow2.f32 %v1353_v0 }
 0x601   :  { %v1696_v14 = vpop.eup %1695  ;;  %v1357_v11 = vsel %vm1311_vm7, %v1694_v24, 0.0  ;;  %1707 = vpow2.f32 %v1355_v48 }
 0x602   :  { %v1698_v49 = vpop.eup %1697  ;;  %v1358_v63 = vsel %vm1311_vm7, %v1696_v14, 0.0 }
 0x603   :  { %v1700_v39 = vpop.eup %1699  ;;  %v1359_v20 = vadd.f32 %v1358_v63, %v1357_v11  ;;  %v1360_v40 = vsel %vm1311_vm7, %v1698_v49, 0.0 }
 0x604   :  { %v1702_v15 = vpop.eup %1701  ;;  %v1362_v28 = vsel %vm1311_vm7, %v1700_v39, 0.0 }
 0x605   :  { %v1361_v32 = vadd.f32 %v1360_v40, %v1359_v20  ;;  %v1704_v22 = vpop.eup %1703  ;;  %v1364_v18 = vsel %vm1311_vm7, %v1702_v15, 0.0  ;;  %v2682_v40 = vmov 1  }
 0x606   :  { %v1706_v53 = vpop.eup %1705  ;;  %v1366_v61 = vsel %vm1311_vm7, %v1704_v22, 0.0 }
 0x607   :  { %v1363_v43 = vadd.f32 %v1362_v28, %v1361_v32  ;;  %v1708_v36 = vpop.eup %1707  ;;  %v1368_v57 = vsel %vm1311_vm7, %v1706_v53, 0.0 }
 0x608   :  { %v1370_v9 = vsel %vm1311_vm7, %v1708_v36, 0.0 }
 0x609   :  { %v1365_v41 = vadd.f32 %v1364_v18, %v1363_v43 }
 0x60b   :  { %v1367_v5 = vadd.f32 %v1366_v61, %v1365_v41 }
 0x60d   :  { %v1369_v6 = vadd.f32 %v1368_v57, %v1367_v5 }
 0x60f   :  { %v1371_v27 = vadd.f32 %v1370_v9, %v1369_v6 }
 0x611   :  { %v1372_v37 = vrot.slane %v1371_v27, 4 }
 0x613   :  { %v1373_v2 = vadd.f32 %v1372_v37, %v1371_v27 }
 0x615   :  { %v1374_v60 = vrot.slane %v1373_v2, 2 }
 0x617   :  { %v1375_v21 = vadd.f32 %v1374_v60, %v1373_v2 }
 0x619   :  { %v1376_v29 = vrot.slane %v1375_v21, 1 }
 0x61b   :  { %v1377_v4 = vadd.f32 %v1376_v29, %v1375_v21 }
 0x61d   :  { %1709 = vrcp.f32 %v1377_v4 }
 0x623   :  { %v1710_v1 = vpop.eup %1709 }
 0x624   :  { %v1381_v17 = vmul.f32 %v1710_v1, %v1698_v49  ;;  %v1380_v31 = vmul.f32 %v1710_v1, %v1696_v14  ;;  %v1379_v16 = vmul.f32 %v1710_v1, %v1694_v24  ;;  %v1383_v0 = vmul.f32 %v1710_v1, %v1702_v15 }
 0x625   :  { %v1382_v48 = vmul.f32 %v1710_v1, %v1700_v39  ;;  %v1386_v11 = vmul.f32 %v1710_v1, %v1708_v36  ;;  %v1385_v63 = vmul.f32 %v1710_v1, %v1706_v53  ;;  %v1384_v20 = vmul.f32 %v1710_v1, %v1704_v22 }
 0x626   :  { %1399 = vperm.xlu2 %1605, %v1381_v17   ;;  %1394 = vperm.xlu1 %1604, %v1380_v31  }
 0x627   :  { %1389 = vperm.xlu0 %1603, %v1379_v16  }
 0x62e   :  { %1409 = vperm.xlu2 %1605, %v1383_v0   ;;  %1404 = vperm.xlu1 %1604, %v1382_v48  }
 0x62f   :  { %1424 = vperm.xlu0 %1603, %v1386_v11  }
 0x636   :  { %1419 = vperm.xlu2 %1605, %v1385_v63   ;;  %1414 = vperm.xlu1 %1604, %v1384_v20  }
 0x637   :  { %1608 = vset.pattern.permute.xlu0 %v2682_v40 }
 0x638   :  { %1436 = vperm.xlu0 %1608, %v1381_v17  }
 0x63e   :  { %1607 = vset.pattern.permute.xlu2 %v2682_v40  ;;  %1606 = vset.pattern.permute.xlu1 %v2682_v40 }
 0x63f   :  { %1432 = vperm.xlu2 %1607, %v1380_v31   ;;  %1428 = vperm.xlu1 %1606, %v1379_v16  }
 0x640   :  { %1456 = vperm.xlu0 %1608, %v1386_v11  }
 0x647   :  { %1444 = vperm.xlu2 %1607, %v1383_v0   ;;  %1440 = vperm.xlu1 %1606, %v1382_v48  }
 0x64f   :  { %1452 = vperm.xlu2 %1607, %v1385_v63   ;;  %1448 = vperm.xlu1 %1606, %v1384_v20  }
 0x680   :  { %v1400_v24 = vpop.permute.xlu2 %1399 }
 0x681   :  { %v1467_v39 = vmul.f32 %v1400_v24, %v2501_v62  ;;  %v1468_v15 = vmul.f32 %v1400_v24, %v2503_v46 }
 0x688   :  { %v1410_v14 = vpop.permute.xlu2 %1409 }
 0x689   :  { %v1475_v62 = vmul.f32 %v1410_v14, %v2525_v25  ;;  %v1476_v46 = vmul.f32 %v1410_v14, %v2527_v38 }
 0x690   :  { %v1420_v49 = vpop.permute.xlu2 %1419 }
 0x691   :  { %v1483_v32 = vmul.f32 %v1420_v49, %v2551_v7  ;;  %v1484_v28 = vmul.f32 %v1420_v49, %v2553_v23 }
 0x693   :  { %v1499_v22 = vadd.f32 %v1483_v32, %v1467_v39  ;;  %v1500_v43 = vadd.f32 %v1484_v28, %v1468_v15 }
 0x695   :  { %1515 = vst [vmem:[%s2673_s7 + $0x40] sm:$0xff] %v1499_v22 }
 0x696   :  { %1516 = vst [vmem:[%s2673_s7 + $0x48] sm:$0xff] %v1500_v43 }
 0x698   :  { %v1395_v18 = vpop.permute.xlu1 %1394 }
 0x699   :  { %v1390_v53 = vpop.permute.xlu0 %1389  ;;  %v1433_v41 = vpop.permute.xlu2 %1432 }
 0x69a   :  { %v1459_v7 = vmul.f32 %v1390_v53, %v2479_v30  ;;  %v1460_v23 = vmul.f32 %v1390_v53, %v2481_v45  ;;  %v1465_v40 = vmul.f32 %v1433_v41, %v2485_v26 }
 0x69c   :  { %v1491_v61 = vadd.f32 %v1475_v62, %v1459_v7  ;;  %v1492_v36 = vadd.f32 %v1476_v46, %v1460_v23 }
 0x69e   :  { %1507 = vst [vmem:[%s2673_s7] sm:$0xff] %v1491_v61 }
 0x69f   :  { %1508 = vst [vmem:[%s2673_s7 + $0x8] sm:$0xff] %v1492_v36 }
 0x6a0   :  { %v1405_v5 = vpop.permute.xlu1 %1404 }
 0x6a1   :  { %v1471_v57 = vmul.f32 %v1405_v5, %v2513_v13  ;;  %v1472_v25 = vmul.f32 %v1405_v5, %v2515_v10  ;;  %v1425_v38 = vpop.permute.xlu0 %1424  ;;  %v1445_v6 = vpop.permute.xlu2 %1444  ;;  %v1463_v13 = vmul.f32 %v1395_v18, %v2489_v34  ;;  %v1464_v10 = vmul.f32 %v1395_v18, %v2491_v58 }
 0x6a2   :  { %v1487_v30 = vmul.f32 %v1425_v38, %v2358_v51  ;;  %v1488_v45 = vmul.f32 %v1425_v38, %v2368_v59 }
 0x6a4   :  { %v1503_v9 = vadd.f32 %v1487_v30, %v1471_v57  ;;  %v1504_v27 = vadd.f32 %v1488_v45, %v1472_v25 }
 0x6a6   :  { %1519 = vst [vmem:[%s2673_s7 + $0x60] sm:$0xff] %v1503_v9 }
 0x6a7   :  { %1520 = vst [vmem:[%s2673_s7 + $0x68] sm:$0xff] %v1504_v27 }
 0x6a8   :  { %v1415_v37 = vpop.permute.xlu1 %1414 }
 0x6a9   :  { %v1479_v2 = vmul.f32 %v1415_v37, %v2539_v42  ;;  %v1480_v51 = vmul.f32 %v1415_v37, %v2541_v35  ;;  %v1453_v59 = vpop.permute.xlu2 %1452  ;;  %v1478_v42 = vmul.f32 %v1445_v6, %v2523_v50 }
 0x6aa   :  { %v1485_v60 = vmul.f32 %v1453_v59, %v2545_v33  ;;  %v1486_v21 = vmul.f32 %v1453_v59, %v2547_v44  ;;  %v1437_v29 = vpop.permute.xlu0 %1436 }
 0x6ab   :  { %v1495_v4 = vadd.f32 %v1479_v2, %v1463_v13  ;;  %v1496_v1 = vadd.f32 %v1480_v51, %v1464_v10  ;;  %v1469_v17 = vmul.f32 %v1437_v29, %v2497_v55  ;;  %v1470_v31 = vmul.f32 %v1437_v29, %v2499_v19 }
 0x6ac   :  { %v1477_v19 = vmul.f32 %v1445_v6, %v2517_v54 }
 0x6ad   :  { %1511 = vst [vmem:[%s2673_s7 + $0x20] sm:$0xff] %v1495_v4  ;;  %v1501_v34 = vadd.f32 %v1485_v60, %v1469_v17  ;;  %v1502_v58 = vadd.f32 %v1486_v21, %v1470_v31 }
 0x6ae   :  { %1512 = vst [vmem:[%s2673_s7 + $0x28] sm:$0xff] %v1496_v1 }
 0x6af   :  { %1517 = vst [vmem:[%s2673_s7 + $0x50] sm:$0xff] %v1501_v34 }
 0x6b0   :  { %1518 = vst [vmem:[%s2673_s7 + $0x58] sm:$0xff] %v1502_v58 }
 0x6b1   :  { %v1429_v55 = vpop.permute.xlu1 %1428 }
 0x6b2   :  { %v1461_v35 = vmul.f32 %v1429_v55, %v2473_v56  ;;  %v1462_v33 = vmul.f32 %v1429_v55, %v2475_v52  ;;  %v1457_v0 = vpop.permute.xlu0 %1456 }
 0x6b3   :  { %v1489_v54 = vmul.f32 %v1457_v0, %v2397_v8  ;;  %v1490_v50 = vmul.f32 %v1457_v0, %v2400_v12  ;;  %v2683_v8 = vld [vmem:[#allocation2_spill] sm:$0xff]  ;;  %v2684_v12 = vld [vmem:[#allocation3_spill] sm:$0xff] }
 0x6b4   :  { %v1493_v44 = vadd.f32 %v1477_v19, %v1461_v35  ;;  %v1494_v16 = vadd.f32 %v1478_v42, %v1462_v33  ;;  %v1466_v24 = vmul.f32 %v1433_v41, %v2683_v8 }
 0x6b6   :  { %1509 = vst [vmem:[%s2673_s7 + $0x10] sm:$0xff] %v1493_v44 }
 0x6b7   :  { %1510 = vst [vmem:[%s2673_s7 + $0x18] sm:$0xff] %v1494_v16 }
 0x6b9   :  { %v1441_v48 = vpop.permute.xlu1 %1440 }
 0x6ba   :  { %v1473_v56 = vmul.f32 %v1441_v48, %v2509_v47  ;;  %v1474_v52 = vmul.f32 %v1441_v48, %v2511_v3  ;;  %v2685_v47 = vld [vmem:[#allocation4_spill] sm:$0xff] }
 0x6bc   :  { %v1505_v11 = vadd.f32 %v1489_v54, %v1473_v56  ;;  %v1506_v63 = vadd.f32 %v1490_v50, %v1474_v52 }
 0x6be   :  { %1521 = vst [vmem:[%s2673_s7 + $0x70] sm:$0xff] %v1505_v11 }
 0x6bf   :  { %1522 = vst [vmem:[%s2673_s7 + $0x78] sm:$0xff] %v1506_v63 }
 0x6c1   :  { %v1449_v20 = vpop.permute.xlu1 %1448 }
 0x6c2   :  { %v1481_v14 = vmul.f32 %v1449_v20, %v2684_v12  ;;  %v1482_v49 = vmul.f32 %v1449_v20, %v2685_v47 }
 0x6c4   :  { %v1497_v3 = vadd.f32 %v1481_v14, %v1465_v40  ;;  %v1498_v39 = vadd.f32 %v1482_v49, %v1466_v24 }
 0x6c6   :  { %1513 = vst [vmem:[%s2673_s7 + $0x30] sm:$0xff] %v1497_v3 }
 0x6c7   :  { %1514 = vst [vmem:[%s2673_s7 + $0x38] sm:$0xff] %v1498_v39 }

</bundles_post_ra>
